<compile_context>
chip_gen: v5e
topology: v5e:2x2
jax: 0.10.0
libtpu: 0.0.40
codegen_flags: <defaults>
</compile_context>

<pallas_src>
import functools
import numpy as np

import jax
import jax.numpy as jnp
from jax.experimental import pallas as pl
from jax.experimental.pallas import tpu as pltpu


_VMEM = pl.BlockSpec(memory_space=pltpu.MemorySpace.VMEM)


def _dot(a, b):
    return jnp.dot(a, b, preferred_element_type=jnp.float32)


def _dot_t(a, b):
    # a @ b.T without materializing the transpose
    return jax.lax.dot_general(a, b, (((1,), (1,)), ((), ())),
                               preferred_element_type=jnp.float32)


def _softmax_last(x):
    m = jnp.max(x, axis=-1, keepdims=True)
    e = jnp.exp(x - m)
    return e * pl.reciprocal(jnp.sum(e, axis=-1, keepdims=True), approx=True)


def _gru_cell(pre_i, h, wh, bh, H):
    # pre_i = x_t @ W_i + b_i, already computed for all timesteps (hoisted).
    # PyTorch GRU gate order [r | z | n]; b_hn stays inside the r-gated term.
    gh = _dot(h, wh) + bh                                   # (B, 3H)
    r = jax.nn.sigmoid(pre_i[:, :H] + gh[:, :H])
    z = jax.nn.sigmoid(pre_i[:, H:2 * H] + gh[:, H:2 * H])
    n = jnp.tanh(pre_i[:, 2 * H:] + r * gh[:, 2 * H:])
    return (1.0 - z) * n + z * h


# --------------------------------------------------------------------------
# Fused forward kernel: GCN + GRUs + query MLP + memory read + output MLP
# --------------------------------------------------------------------------
def _fused_forward_kernel(*refs, T, E, H, V, use_history):
    if use_history:
        (i1_ref, i23_ref,
         wi0_ref, wh0_ref, bi0_ref, bh0_ref,
         wi1_ref, wh1_ref, bi1_ref, bh1_ref,
         wq_ref, bq_ref,
         adj_ref, gw1_ref, gb1_ref, gw2_ref, gb2_ref,
         wo1_ref, bo1_ref, wo2_ref, bo2_ref,
         hv_ref, out_ref) = refs
    else:
        (i1_ref, i23_ref,
         wi0_ref, wh0_ref, bi0_ref, bh0_ref,
         wi1_ref, wh1_ref, bi1_ref, bh1_ref,
         wq_ref, bq_ref,
         adj_ref, gw1_ref, gb1_ref, gw2_ref, gb2_ref,
         wo1_ref, bo1_ref, wo2_ref, bo2_ref,
         out_ref) = refs
        hv_ref = None

    # ---- GCN drug memory (x = I  =>  gcn1 support is W1) ------------------
    adj = adj_ref[...]                                           # (V, V)
    h1 = jnp.maximum(_dot(adj, gw1_ref[...]) + gb1_ref[...], 0.0)
    dm = _dot(adj, _dot(h1, gw2_ref[...])) + gb2_ref[...]        # (V, E)

    # ---- GRU input-side projections, hoisted out of the recurrence --------
    pre0 = _dot(i1_ref[...], wi0_ref[...]) + bi0_ref[...]        # (T, 3H)
    # i23 rows are interleaved [i2_t; i3_t] so pre23[2t:2t+2] is the batch.
    pre23 = _dot(i23_ref[...], wi1_ref[...]) + bi1_ref[...]      # (2T, 3H)

    wh0 = wh0_ref[...]
    bh0 = bh0_ref[...]
    wh1 = wh1_ref[...]
    bh1 = bh1_ref[...]

    # ---- fully unrolled recurrence (T is a static trace-time constant) ----
    h0 = jnp.zeros((1, H), jnp.float32)     # encoders[0] state (diag seq)
    h23 = jnp.zeros((2, H), jnp.float32)    # encoders[1] state (proc + age)
    p_rows = []
    for t in range(T):
        h0 = _gru_cell(pre0[t:t + 1, :], h0, wh0, bh0, H)
        h23 = _gru_cell(pre23[2 * t:2 * t + 2, :], h23, wh1, bh1, H)
        p_rows.append(jnp.concatenate([h0, h23[0:1], h23[1:2]], axis=-1))
    P = jnp.concatenate(p_rows, axis=0)                          # (T, 6E)

    # ---- query MLP: ReLU -> Linear -----------------------------------------
    queries = _dot(jnp.maximum(P, 0.0), wq_ref[...]) + bq_ref[...]   # (T, E)
    query = queries[T - 1:T]                                         # (1, E)

    # ---- memory read -------------------------------------------------------
    kw1 = _softmax_last(_dot_t(query, dm))                       # (1, V)
    fact1 = _dot(kw1, dm)                                        # (1, E)
    if use_history:
        hk = queries[:T - 1]                                     # (T-1, E)
        vw = _softmax_last(_dot_t(query, hk))                    # (1, T-1)
        fact2 = _dot(_dot(vw, hv_ref[...]), dm)                  # (1, E)
    else:
        fact2 = fact1

    # ---- output MLP: ReLU -> Linear -> ReLU -> Linear ----------------------
    x = jnp.concatenate([query, fact1, fact2], axis=-1)          # (1, 3E)
    h = jnp.maximum(_dot(jnp.maximum(x, 0.0), wo1_ref[...]) + bo1_ref[...],
                    0.0)                                         # (1, 2E)
    out_ref[...] = _dot(h, wo2_ref[...]) + bo2_ref[...]          # (1, V)


def gamenet_fused_call(params, i1, i23, hv, use_history, T, E, V):
    H = 2 * E
    g0, g1 = params['gru'][0], params['gru'][1]
    args = [i1, i23,
            g0['wi'], g0['wh'], g0['bi'], g0['bh'],
            g1['wi'], g1['wh'], g1['bi'], g1['bh'],
            params['wq'], params['bq'],
            params['adj'], params['gcn_w1'], params['gcn_b1'],
            params['gcn_w2'], params['gcn_b2'],
            params['wo1'], params['bo1'], params['wo2'], params['bo2']]
    if use_history:
        args.append(hv)
    kernel = functools.partial(_fused_forward_kernel, T=T, E=E, H=H, V=V,
                               use_history=use_history)
    return pl.pallas_call(
        kernel,
        out_shape=jax.ShapeDtypeStruct((1, V), jnp.float32),
        in_specs=[_VMEM] * len(args),
        out_specs=_VMEM,
    )(*args)


# --------------------------------------------------------------------------
# Parameter init (deterministic, shapes from the PyTorch __init__)
# --------------------------------------------------------------------------
def init_params(key, vocab_size, emb_dim, ehr_adj):
    E = emb_dim
    H = 2 * E
    V = vocab_size[-1]
    keys = iter(jax.random.split(key, 32))

    def u(shape, scale):
        return jax.random.uniform(next(keys), shape, jnp.float32, -scale, scale)

    params = {}
    # nn.Embedding weights, uniform(-0.1, 0.1)
    params['emb'] = [u((vocab_size[i], E), 0.1) for i in range(3)]

    # 2 distinct GRUs used (encoders[0], encoders[1]); stored pre-transposed
    # and gate-concatenated [r | z | n].
    s = 1.0 / np.sqrt(H)
    params['gru'] = []
    for _ in range(2):
        params['gru'].append({
            'wi': u((E, 3 * H), s),
            'wh': u((H, 3 * H), s),
            'bi': u((1, 3 * H), s),
            'bh': u((1, 3 * H), s),
        })

    # query: Linear(6E -> E), stored as (in, out)
    sq = 1.0 / np.sqrt(6 * E)
    params['wq'] = u((6 * E, E), sq)
    params['bq'] = u((1, E), sq)

    # GCN layers
    sg = 1.0 / np.sqrt(E)
    params['gcn_w1'] = u((V, E), sg)
    params['gcn_b1'] = u((1, E), sg)
    params['gcn_w2'] = u((E, E), sg)
    params['gcn_b2'] = u((1, E), sg)

    # output MLP: Linear(3E -> 2E), Linear(2E -> V)
    s1 = 1.0 / np.sqrt(3 * E)
    params['wo1'] = u((3 * E, 2 * E), s1)
    params['bo1'] = u((1, 2 * E), s1)
    s2 = 1.0 / np.sqrt(2 * E)
    params['wo2'] = u((2 * E, V), s2)
    params['bo2'] = u((1, V), s2)

    # row-normalized (adj + I), same as GCN.normalize in the reference
    adj = np.asarray(ehr_adj, np.float64) + np.eye(V)
    rowsum = adj.sum(1)
    r_inv = np.where(rowsum > 0, 1.0 / rowsum, 0.0)
    params['adj'] = jnp.asarray((adj * r_inv[:, None]).astype(np.float32))
    return params


# --------------------------------------------------------------------------
# Host-side glue: padded gather + masked mean for the embedding lookups
# --------------------------------------------------------------------------
def _padded_indices(code_lists):
    T = len(code_lists)
    L = max(len(c) for c in code_lists)
    idx = np.zeros((T, L), np.int32)
    mask = np.zeros((T, L), np.float32)
    for t, c in enumerate(code_lists):
        idx[t, :len(c)] = np.asarray(c, np.int32)
        mask[t, :len(c)] = 1.0
    return jnp.asarray(idx), jnp.asarray(mask)


def _mean_embed(emb, idx, mask):
    g = emb[idx]                                            # (T, L, E)
    return (g * mask[..., None]).sum(1) / mask.sum(1, keepdims=True)


def gamenet_forward(params, input_adms, age, vocab_size, emb_dim):
    E = emb_dim
    V = vocab_size[-1]
    T = len(input_adms)

    # embedding lookup + mean over codes (dropout is identity in eval)
    idx1, m1 = _padded_indices([a[0] for a in input_adms])
    idx2, m2 = _padded_indices([a[1] for a in input_adms])
    i1 = _mean_embed(params['emb'][0], idx1, m1)            # (T, E)
    i2 = _mean_embed(params['emb'][1], idx2, m2)            # (T, E)
    i3 = jnp.broadcast_to(params['emb'][2][age][None, :], (T, E))

    # interleave the two encoders[1] sequences -> batched (2,H)-state GRU
    i23 = jnp.stack([i2, i3], axis=1).reshape(2 * T, E)     # (2T, E)

    use_history = T > 1
    if use_history:
        hv_np = np.zeros((T - 1, V), np.float32)
        for t, adm in enumerate(input_adms[:-1]):
            hv_np[t, np.asarray(adm[2])] = 1.0
        hv = jnp.asarray(hv_np)
    else:
        hv = None

    return gamenet_fused_call(params, i1, i23, hv, use_history, T, E, V)


# --------------------------------------------------------------------------
# Pure-JAX reference (for correctness check only)
# --------------------------------------------------------------------------
def reference_forward(params, input_adms, age, vocab_size, emb_dim):
    E = emb_dim
    H = 2 * E
    V = vocab_size[-1]
    T = len(input_adms)

    def gru_ref(x, g):
        def step(h, x_t):
            pre = x_t[None, :] @ g['wi'] + g['bi']
            gh = h @ g['wh'] + g['bh']
            r = jax.nn.sigmoid(pre[:, :H] + gh[:, :H])
            z = jax.nn.sigmoid(pre[:, H:2 * H] + gh[:, H:2 * H])
            n = jnp.tanh(pre[:, 2 * H:] + r * gh[:, 2 * H:])
            h_new = (1.0 - z) * n + z * h
            return h_new, h_new[0]
        _, os = jax.lax.scan(step, jnp.zeros((1, H), jnp.float32), x)
        return os

    i1 = jnp.stack([jnp.mean(params['emb'][0][jnp.asarray(a[0])], axis=0)
                    for a in input_adms])
    i2 = jnp.stack([jnp.mean(params['emb'][1][jnp.asarray(a[1])], axis=0)
                    for a in input_adms])
    i3 = jnp.stack([params['emb'][2][age] for _ in input_adms])

    o1 = gru_ref(i1, params['gru'][0])
    o2 = gru_ref(i2, params['gru'][1])
    o3 = gru_ref(i3, params['gru'][1])   # encoders[1] reused, as in reference
    P = jnp.concatenate([o1, o2, o3], axis=-1)
    queries = jnp.maximum(P, 0.0) @ params['wq'] + params['bq']
    query = queries[T - 1:T]

    adj = params['adj']
    h1 = jnp.maximum(adj @ params['gcn_w1'] + params['gcn_b1'], 0.0)
    dm = adj @ (h1 @ params['gcn_w2']) + params['gcn_b2']

    kw1 = jax.nn.softmax(query @ dm.T, axis=-1)
    fact1 = kw1 @ dm
    if T > 1:
        hk = queries[:T - 1]
        hv_np = np.zeros((T - 1, V), np.float32)
        for idx, adm in enumerate(input_adms[:-1]):
            hv_np[idx, np.asarray(adm[2])] = 1.0
        hv = jnp.asarray(hv_np)
        vw = jax.nn.softmax(query @ hk.T, axis=-1)
        fact2 = (vw @ hv) @ dm
    else:
        fact2 = fact1

    x = jnp.concatenate([query, fact1, fact2], axis=-1)
    h = jnp.maximum(jnp.maximum(x, 0.0) @ params['wo1'] + params['bo1'], 0.0)
    return h @ params['wo2'] + params['bo2']


# --------------------------------------------------------------------------
if __name__ == "__main__":
    vocab_size = (16, 20, 10, 24)   # (diag, proc, age, med) vocabularies
    emb_dim = 32
    V = vocab_size[-1]

    key = jax.random.PRNGKey(0)
    kadj, kparam = jax.random.split(key)

    ehr_adj = np.asarray(
        (jax.random.uniform(kadj, (V, V)) > 0.7).astype(jnp.float32))
    ehr_adj = np.maximum(ehr_adj, ehr_adj.T)

    params = init_params(kparam, vocab_size, emb_dim, ehr_adj)

    # 3 admissions: [diagnosis codes, procedure codes, medication codes]
    input_adms = [
        [[0, 3, 7], [1, 4], [2, 5, 9]],
        [[2, 5], [0, 6, 8], [1, 7, 11]],
        [[1, 4, 9, 12], [3, 5, 7], [0, 3]],
    ]
    age = 4

    # multi-admission path (uses history memory)
    out = gamenet_forward(params, input_adms, age, vocab_size, emb_dim)
    out = jax.block_until_ready(out)
    assert out.shape == (1, V)
    ref = reference_forward(params, input_adms, age, vocab_size, emb_dim)
    np.testing.assert_allclose(np.asarray(out), np.asarray(ref),
                               rtol=2e-3, atol=2e-3)

    # single-admission path (use_history=False branch)
    out1 = gamenet_forward(params, input_adms[:1], age, vocab_size, emb_dim)
    out1 = jax.block_until_ready(out1)
    ref1 = reference_forward(params, input_adms[:1], age, vocab_size, emb_dim)
    np.testing.assert_allclose(np.asarray(out1), np.asarray(ref1),
                               rtol=2e-3, atol=2e-3)

    print("KERNEL_OK")
</pallas_src>

<mosaic_0001>
module attributes {stable_mosaic.version = 11 : i64} {
  func.func @_fused_forward_kernel(%arg0: memref<3x32xf32, #tpu.memory_space<vmem>>, %arg1: memref<6x32xf32, #tpu.memory_space<vmem>>, %arg2: memref<32x192xf32, #tpu.memory_space<vmem>>, %arg3: memref<64x192xf32, #tpu.memory_space<vmem>>, %arg4: memref<1x192xf32, #tpu.memory_space<vmem>>, %arg5: memref<1x192xf32, #tpu.memory_space<vmem>>, %arg6: memref<32x192xf32, #tpu.memory_space<vmem>>, %arg7: memref<64x192xf32, #tpu.memory_space<vmem>>, %arg8: memref<1x192xf32, #tpu.memory_space<vmem>>, %arg9: memref<1x192xf32, #tpu.memory_space<vmem>>, %arg10: memref<192x32xf32, #tpu.memory_space<vmem>>, %arg11: memref<1x32xf32, #tpu.memory_space<vmem>>, %arg12: memref<24x24xf32, #tpu.memory_space<vmem>>, %arg13: memref<24x32xf32, #tpu.memory_space<vmem>>, %arg14: memref<1x32xf32, #tpu.memory_space<vmem>>, %arg15: memref<32x32xf32, #tpu.memory_space<vmem>>, %arg16: memref<1x32xf32, #tpu.memory_space<vmem>>, %arg17: memref<96x64xf32, #tpu.memory_space<vmem>>, %arg18: memref<1x64xf32, #tpu.memory_space<vmem>>, %arg19: memref<64x24xf32, #tpu.memory_space<vmem>>, %arg20: memref<1x24xf32, #tpu.memory_space<vmem>>, %arg21: memref<2x24xf32, #tpu.memory_space<vmem>>, %arg22: memref<1x24xf32, #tpu.memory_space<vmem>>) attributes {dimension_semantics = [], scalar_prefetch = 0 : i64, scratch_operands = 0 : i64, tpu.core_type = #tpu.core_type<tc>} {
    %c0 = arith.constant 0 : index
    %c0_0 = arith.constant 0 : index
    %0 = vector.load %arg12[%c0, %c0_0] : memref<24x24xf32, #tpu.memory_space<vmem>>, vector<24x24xf32>
    %c0_1 = arith.constant 0 : index
    %c0_2 = arith.constant 0 : index
    %1 = vector.load %arg13[%c0_1, %c0_2] : memref<24x32xf32, #tpu.memory_space<vmem>>, vector<24x32xf32>
    %cst = arith.constant dense<0.000000e+00> : vector<24x32xf32>
    %2 = tpu.matmul %0, %1, %cst {dimension_numbers = #tpu.dot_dimension_numbers<[1], [0], [0], [1], [0, 0, 1, 1], [], []>} : vector<24x24xf32>, vector<24x32xf32>, vector<24x32xf32> -> vector<24x32xf32>
    %c0_3 = arith.constant 0 : index
    %c0_4 = arith.constant 0 : index
    %3 = vector.load %arg14[%c0_3, %c0_4] : memref<1x32xf32, #tpu.memory_space<vmem>>, vector<1x32xf32>
    %4 = vector.broadcast %3 : vector<1x32xf32> to vector<24x32xf32>
    %5 = arith.addf %2, %4 : vector<24x32xf32>
    %cst_5 = arith.constant 0.000000e+00 : f32
    %6 = vector.broadcast %cst_5 : f32 to vector<24x32xf32>
    %7 = arith.maximumf %5, %6 : vector<24x32xf32>
    %c0_6 = arith.constant 0 : index
    %c0_7 = arith.constant 0 : index
    %8 = vector.load %arg15[%c0_6, %c0_7] : memref<32x32xf32, #tpu.memory_space<vmem>>, vector<32x32xf32>
    %cst_8 = arith.constant dense<0.000000e+00> : vector<24x32xf32>
    %9 = tpu.matmul %7, %8, %cst_8 {dimension_numbers = #tpu.dot_dimension_numbers<[1], [0], [0], [1], [0, 0, 1, 1], [], []>} : vector<24x32xf32>, vector<32x32xf32>, vector<24x32xf32> -> vector<24x32xf32>
    %cst_9 = arith.constant dense<0.000000e+00> : vector<24x32xf32>
    %10 = tpu.matmul %0, %9, %cst_9 {dimension_numbers = #tpu.dot_dimension_numbers<[1], [0], [0], [1], [0, 0, 1, 1], [], []>} : vector<24x24xf32>, vector<24x32xf32>, vector<24x32xf32> -> vector<24x32xf32>
    %c0_10 = arith.constant 0 : index
    %c0_11 = arith.constant 0 : index
    %11 = vector.load %arg16[%c0_10, %c0_11] : memref<1x32xf32, #tpu.memory_space<vmem>>, vector<1x32xf32>
    %12 = vector.broadcast %11 : vector<1x32xf32> to vector<24x32xf32>
    %13 = arith.addf %10, %12 : vector<24x32xf32>
    %c0_12 = arith.constant 0 : index
    %c0_13 = arith.constant 0 : index
    %14 = vector.load %arg0[%c0_12, %c0_13] : memref<3x32xf32, #tpu.memory_space<vmem>>, vector<3x32xf32>
    %c0_14 = arith.constant 0 : index
    %c0_15 = arith.constant 0 : index
    %15 = vector.load %arg2[%c0_14, %c0_15] : memref<32x192xf32, #tpu.memory_space<vmem>>, vector<32x192xf32>
    %cst_16 = arith.constant dense<0.000000e+00> : vector<3x192xf32>
    %16 = tpu.matmul %14, %15, %cst_16 {dimension_numbers = #tpu.dot_dimension_numbers<[1], [0], [0], [1], [0, 0, 1, 1], [], []>} : vector<3x32xf32>, vector<32x192xf32>, vector<3x192xf32> -> vector<3x192xf32>
    %c0_17 = arith.constant 0 : index
    %c0_18 = arith.constant 0 : index
    %17 = vector.load %arg4[%c0_17, %c0_18] : memref<1x192xf32, #tpu.memory_space<vmem>>, vector<1x192xf32>
    %18 = vector.broadcast %17 : vector<1x192xf32> to vector<3x192xf32>
    %19 = arith.addf %16, %18 : vector<3x192xf32>
    %c0_19 = arith.constant 0 : index
    %c0_20 = arith.constant 0 : index
    %20 = vector.load %arg1[%c0_19, %c0_20] : memref<6x32xf32, #tpu.memory_space<vmem>>, vector<6x32xf32>
    %c0_21 = arith.constant 0 : index
    %c0_22 = arith.constant 0 : index
    %21 = vector.load %arg6[%c0_21, %c0_22] : memref<32x192xf32, #tpu.memory_space<vmem>>, vector<32x192xf32>
    %cst_23 = arith.constant dense<0.000000e+00> : vector<6x192xf32>
    %22 = tpu.matmul %20, %21, %cst_23 {dimension_numbers = #tpu.dot_dimension_numbers<[1], [0], [0], [1], [0, 0, 1, 1], [], []>} : vector<6x32xf32>, vector<32x192xf32>, vector<6x192xf32> -> vector<6x192xf32>
    %c0_24 = arith.constant 0 : index
    %c0_25 = arith.constant 0 : index
    %23 = vector.load %arg8[%c0_24, %c0_25] : memref<1x192xf32, #tpu.memory_space<vmem>>, vector<1x192xf32>
    %24 = vector.broadcast %23 : vector<1x192xf32> to vector<6x192xf32>
    %25 = arith.addf %22, %24 : vector<6x192xf32>
    %c0_26 = arith.constant 0 : index
    %c0_27 = arith.constant 0 : index
    %26 = vector.load %arg3[%c0_26, %c0_27] : memref<64x192xf32, #tpu.memory_space<vmem>>, vector<64x192xf32>
    %c0_28 = arith.constant 0 : index
    %c0_29 = arith.constant 0 : index
    %27 = vector.load %arg5[%c0_28, %c0_29] : memref<1x192xf32, #tpu.memory_space<vmem>>, vector<1x192xf32>
    %c0_30 = arith.constant 0 : index
    %c0_31 = arith.constant 0 : index
    %28 = vector.load %arg7[%c0_30, %c0_31] : memref<64x192xf32, #tpu.memory_space<vmem>>, vector<64x192xf32>
    %c0_32 = arith.constant 0 : index
    %c0_33 = arith.constant 0 : index
    %29 = vector.load %arg9[%c0_32, %c0_33] : memref<1x192xf32, #tpu.memory_space<vmem>>, vector<1x192xf32>
    %cst_34 = arith.constant 0.000000e+00 : f32
    %30 = vector.broadcast %cst_34 : f32 to vector<1x64xf32>
    %cst_35 = arith.constant 0.000000e+00 : f32
    %31 = vector.broadcast %cst_35 : f32 to vector<2x64xf32>
    %32 = vector.extract_strided_slice %19 {offsets = [0, 0], sizes = [1, 192], strides = [1, 1]} : vector<3x192xf32> to vector<1x192xf32>
    %cst_36 = arith.constant dense<0.000000e+00> : vector<1x192xf32>
    %33 = tpu.matmul %30, %26, %cst_36 {dimension_numbers = #tpu.dot_dimension_numbers<[1], [0], [0], [1], [0, 0, 1, 1], [], []>} : vector<1x64xf32>, vector<64x192xf32>, vector<1x192xf32> -> vector<1x192xf32>
    %34 = arith.addf %33, %27 : vector<1x192xf32>
    %35 = vector.extract_strided_slice %32 {offsets = [0, 0], sizes = [1, 64], strides = [1, 1]} : vector<1x192xf32> to vector<1x64xf32>
    %36 = vector.extract_strided_slice %34 {offsets = [0, 0], sizes = [1, 64], strides = [1, 1]} : vector<1x192xf32> to vector<1x64xf32>
    %37 = arith.addf %35, %36 : vector<1x64xf32>
    %38 = arith.negf %37 : vector<1x64xf32>
    %39 = math.exp %38 : vector<1x64xf32>
    %cst_37 = arith.constant 1.000000e+00 : f32
    %40 = vector.broadcast %cst_37 : f32 to vector<1x64xf32>
    %41 = arith.addf %40, %39 : vector<1x64xf32>
    %42 = arith.divf %40, %41 : vector<1x64xf32>
    %43 = vector.extract_strided_slice %32 {offsets = [0, 64], sizes = [1, 64], strides = [1, 1]} : vector<1x192xf32> to vector<1x64xf32>
    %44 = vector.extract_strided_slice %34 {offsets = [0, 64], sizes = [1, 64], strides = [1, 1]} : vector<1x192xf32> to vector<1x64xf32>
    %45 = arith.addf %43, %44 : vector<1x64xf32>
    %46 = arith.negf %45 : vector<1x64xf32>
    %47 = math.exp %46 : vector<1x64xf32>
    %cst_38 = arith.constant 1.000000e+00 : f32
    %48 = vector.broadcast %cst_38 : f32 to vector<1x64xf32>
    %49 = arith.addf %48, %47 : vector<1x64xf32>
    %50 = arith.divf %48, %49 : vector<1x64xf32>
    %51 = vector.extract_strided_slice %32 {offsets = [0, 128], sizes = [1, 64], strides = [1, 1]} : vector<1x192xf32> to vector<1x64xf32>
    %52 = vector.extract_strided_slice %34 {offsets = [0, 128], sizes = [1, 64], strides = [1, 1]} : vector<1x192xf32> to vector<1x64xf32>
    %53 = arith.mulf %42, %52 : vector<1x64xf32>
    %54 = arith.addf %51, %53 : vector<1x64xf32>
    %55 = math.tanh %54 : vector<1x64xf32>
    %cst_39 = arith.constant 1.000000e+00 : f32
    %56 = vector.broadcast %cst_39 : f32 to vector<1x64xf32>
    %57 = arith.subf %56, %50 : vector<1x64xf32>
    %58 = arith.mulf %57, %55 : vector<1x64xf32>
    %59 = arith.mulf %50, %30 : vector<1x64xf32>
    %60 = arith.addf %58, %59 : vector<1x64xf32>
    %61 = vector.extract_strided_slice %25 {offsets = [0, 0], sizes = [2, 192], strides = [1, 1]} : vector<6x192xf32> to vector<2x192xf32>
    %cst_40 = arith.constant dense<0.000000e+00> : vector<2x192xf32>
    %62 = tpu.matmul %31, %28, %cst_40 {dimension_numbers = #tpu.dot_dimension_numbers<[1], [0], [0], [1], [0, 0, 1, 1], [], []>} : vector<2x64xf32>, vector<64x192xf32>, vector<2x192xf32> -> vector<2x192xf32>
    %63 = vector.broadcast %29 : vector<1x192xf32> to vector<2x192xf32>
    %64 = arith.addf %62, %63 : vector<2x192xf32>
    %65 = vector.extract_strided_slice %61 {offsets = [0, 0], sizes = [2, 64], strides = [1, 1]} : vector<2x192xf32> to vector<2x64xf32>
    %66 = vector.extract_strided_slice %64 {offsets = [0, 0], sizes = [2, 64], strides = [1, 1]} : vector<2x192xf32> to vector<2x64xf32>
    %67 = arith.addf %65, %66 : vector<2x64xf32>
    %68 = arith.negf %67 : vector<2x64xf32>
    %69 = math.exp %68 : vector<2x64xf32>
    %cst_41 = arith.constant 1.000000e+00 : f32
    %70 = vector.broadcast %cst_41 : f32 to vector<2x64xf32>
    %71 = arith.addf %70, %69 : vector<2x64xf32>
    %72 = arith.divf %70, %71 : vector<2x64xf32>
    %73 = vector.extract_strided_slice %61 {offsets = [0, 64], sizes = [2, 64], strides = [1, 1]} : vector<2x192xf32> to vector<2x64xf32>
    %74 = vector.extract_strided_slice %64 {offsets = [0, 64], sizes = [2, 64], strides = [1, 1]} : vector<2x192xf32> to vector<2x64xf32>
    %75 = arith.addf %73, %74 : vector<2x64xf32>
    %76 = arith.negf %75 : vector<2x64xf32>
    %77 = math.exp %76 : vector<2x64xf32>
    %cst_42 = arith.constant 1.000000e+00 : f32
    %78 = vector.broadcast %cst_42 : f32 to vector<2x64xf32>
    %79 = arith.addf %78, %77 : vector<2x64xf32>
    %80 = arith.divf %78, %79 : vector<2x64xf32>
    %81 = vector.extract_strided_slice %61 {offsets = [0, 128], sizes = [2, 64], strides = [1, 1]} : vector<2x192xf32> to vector<2x64xf32>
    %82 = vector.extract_strided_slice %64 {offsets = [0, 128], sizes = [2, 64], strides = [1, 1]} : vector<2x192xf32> to vector<2x64xf32>
    %83 = arith.mulf %72, %82 : vector<2x64xf32>
    %84 = arith.addf %81, %83 : vector<2x64xf32>
    %85 = math.tanh %84 : vector<2x64xf32>
    %cst_43 = arith.constant 1.000000e+00 : f32
    %86 = vector.broadcast %cst_43 : f32 to vector<2x64xf32>
    %87 = arith.subf %86, %80 : vector<2x64xf32>
    %88 = arith.mulf %87, %85 : vector<2x64xf32>
    %89 = arith.mulf %80, %31 : vector<2x64xf32>
    %90 = arith.addf %88, %89 : vector<2x64xf32>
    %91 = vector.extract_strided_slice %90 {offsets = [0, 0], sizes = [1, 64], strides = [1, 1]} : vector<2x64xf32> to vector<1x64xf32>
    %92 = vector.extract_strided_slice %90 {offsets = [1, 0], sizes = [1, 64], strides = [1, 1]} : vector<2x64xf32> to vector<1x64xf32>
    %93 = tpu.concatenate %60, %91, %92 in 1 : vector<1x64xf32>, vector<1x64xf32>, vector<1x64xf32> -> vector<1x192xf32>
    %94 = vector.extract_strided_slice %19 {offsets = [1, 0], sizes = [1, 192], strides = [1, 1]} : vector<3x192xf32> to vector<1x192xf32>
    %cst_44 = arith.constant dense<0.000000e+00> : vector<1x192xf32>
    %95 = tpu.matmul %60, %26, %cst_44 {dimension_numbers = #tpu.dot_dimension_numbers<[1], [0], [0], [1], [0, 0, 1, 1], [], []>} : vector<1x64xf32>, vector<64x192xf32>, vector<1x192xf32> -> vector<1x192xf32>
    %96 = arith.addf %95, %27 : vector<1x192xf32>
    %97 = vector.extract_strided_slice %94 {offsets = [0, 0], sizes = [1, 64], strides = [1, 1]} : vector<1x192xf32> to vector<1x64xf32>
    %98 = vector.extract_strided_slice %96 {offsets = [0, 0], sizes = [1, 64], strides = [1, 1]} : vector<1x192xf32> to vector<1x64xf32>
    %99 = arith.addf %97, %98 : vector<1x64xf32>
    %100 = arith.negf %99 : vector<1x64xf32>
    %101 = math.exp %100 : vector<1x64xf32>
    %cst_45 = arith.constant 1.000000e+00 : f32
    %102 = vector.broadcast %cst_45 : f32 to vector<1x64xf32>
    %103 = arith.addf %102, %101 : vector<1x64xf32>
    %104 = arith.divf %102, %103 : vector<1x64xf32>
    %105 = vector.extract_strided_slice %94 {offsets = [0, 64], sizes = [1, 64], strides = [1, 1]} : vector<1x192xf32> to vector<1x64xf32>
    %106 = vector.extract_strided_slice %96 {offsets = [0, 64], sizes = [1, 64], strides = [1, 1]} : vector<1x192xf32> to vector<1x64xf32>
    %107 = arith.addf %105, %106 : vector<1x64xf32>
    %108 = arith.negf %107 : vector<1x64xf32>
    %109 = math.exp %108 : vector<1x64xf32>
    %cst_46 = arith.constant 1.000000e+00 : f32
    %110 = vector.broadcast %cst_46 : f32 to vector<1x64xf32>
    %111 = arith.addf %110, %109 : vector<1x64xf32>
    %112 = arith.divf %110, %111 : vector<1x64xf32>
    %113 = vector.extract_strided_slice %94 {offsets = [0, 128], sizes = [1, 64], strides = [1, 1]} : vector<1x192xf32> to vector<1x64xf32>
    %114 = vector.extract_strided_slice %96 {offsets = [0, 128], sizes = [1, 64], strides = [1, 1]} : vector<1x192xf32> to vector<1x64xf32>
    %115 = arith.mulf %104, %114 : vector<1x64xf32>
    %116 = arith.addf %113, %115 : vector<1x64xf32>
    %117 = math.tanh %116 : vector<1x64xf32>
    %cst_47 = arith.constant 1.000000e+00 : f32
    %118 = vector.broadcast %cst_47 : f32 to vector<1x64xf32>
    %119 = arith.subf %118, %112 : vector<1x64xf32>
    %120 = arith.mulf %119, %117 : vector<1x64xf32>
    %121 = arith.mulf %112, %60 : vector<1x64xf32>
    %122 = arith.addf %120, %121 : vector<1x64xf32>
    %123 = vector.extract_strided_slice %25 {offsets = [2, 0], sizes = [2, 192], strides = [1, 1]} : vector<6x192xf32> to vector<2x192xf32>
    %cst_48 = arith.constant dense<0.000000e+00> : vector<2x192xf32>
    %124 = tpu.matmul %90, %28, %cst_48 {dimension_numbers = #tpu.dot_dimension_numbers<[1], [0], [0], [1], [0, 0, 1, 1], [], []>} : vector<2x64xf32>, vector<64x192xf32>, vector<2x192xf32> -> vector<2x192xf32>
    %125 = vector.broadcast %29 : vector<1x192xf32> to vector<2x192xf32>
    %126 = arith.addf %124, %125 : vector<2x192xf32>
    %127 = vector.extract_strided_slice %123 {offsets = [0, 0], sizes = [2, 64], strides = [1, 1]} : vector<2x192xf32> to vector<2x64xf32>
    %128 = vector.extract_strided_slice %126 {offsets = [0, 0], sizes = [2, 64], strides = [1, 1]} : vector<2x192xf32> to vector<2x64xf32>
    %129 = arith.addf %127, %128 : vector<2x64xf32>
    %130 = arith.negf %129 : vector<2x64xf32>
    %131 = math.exp %130 : vector<2x64xf32>
    %cst_49 = arith.constant 1.000000e+00 : f32
    %132 = vector.broadcast %cst_49 : f32 to vector<2x64xf32>
    %133 = arith.addf %132, %131 : vector<2x64xf32>
    %134 = arith.divf %132, %133 : vector<2x64xf32>
    %135 = vector.extract_strided_slice %123 {offsets = [0, 64], sizes = [2, 64], strides = [1, 1]} : vector<2x192xf32> to vector<2x64xf32>
    %136 = vector.extract_strided_slice %126 {offsets = [0, 64], sizes = [2, 64], strides = [1, 1]} : vector<2x192xf32> to vector<2x64xf32>
    %137 = arith.addf %135, %136 : vector<2x64xf32>
    %138 = arith.negf %137 : vector<2x64xf32>
    %139 = math.exp %138 : vector<2x64xf32>
    %cst_50 = arith.constant 1.000000e+00 : f32
    %140 = vector.broadcast %cst_50 : f32 to vector<2x64xf32>
    %141 = arith.addf %140, %139 : vector<2x64xf32>
    %142 = arith.divf %140, %141 : vector<2x64xf32>
    %143 = vector.extract_strided_slice %123 {offsets = [0, 128], sizes = [2, 64], strides = [1, 1]} : vector<2x192xf32> to vector<2x64xf32>
    %144 = vector.extract_strided_slice %126 {offsets = [0, 128], sizes = [2, 64], strides = [1, 1]} : vector<2x192xf32> to vector<2x64xf32>
    %145 = arith.mulf %134, %144 : vector<2x64xf32>
    %146 = arith.addf %143, %145 : vector<2x64xf32>
    %147 = math.tanh %146 : vector<2x64xf32>
    %cst_51 = arith.constant 1.000000e+00 : f32
    %148 = vector.broadcast %cst_51 : f32 to vector<2x64xf32>
    %149 = arith.subf %148, %142 : vector<2x64xf32>
    %150 = arith.mulf %149, %147 : vector<2x64xf32>
    %151 = arith.mulf %142, %90 : vector<2x64xf32>
    %152 = arith.addf %150, %151 : vector<2x64xf32>
    %153 = vector.extract_strided_slice %152 {offsets = [0, 0], sizes = [1, 64], strides = [1, 1]} : vector<2x64xf32> to vector<1x64xf32>
    %154 = vector.extract_strided_slice %152 {offsets = [1, 0], sizes = [1, 64], strides = [1, 1]} : vector<2x64xf32> to vector<1x64xf32>
    %155 = tpu.concatenate %122, %153, %154 in 1 : vector<1x64xf32>, vector<1x64xf32>, vector<1x64xf32> -> vector<1x192xf32>
    %156 = vector.extract_strided_slice %19 {offsets = [2, 0], sizes = [1, 192], strides = [1, 1]} : vector<3x192xf32> to vector<1x192xf32>
    %cst_52 = arith.constant dense<0.000000e+00> : vector<1x192xf32>
    %157 = tpu.matmul %122, %26, %cst_52 {dimension_numbers = #tpu.dot_dimension_numbers<[1], [0], [0], [1], [0, 0, 1, 1], [], []>} : vector<1x64xf32>, vector<64x192xf32>, vector<1x192xf32> -> vector<1x192xf32>
    %158 = arith.addf %157, %27 : vector<1x192xf32>
    %159 = vector.extract_strided_slice %156 {offsets = [0, 0], sizes = [1, 64], strides = [1, 1]} : vector<1x192xf32> to vector<1x64xf32>
    %160 = vector.extract_strided_slice %158 {offsets = [0, 0], sizes = [1, 64], strides = [1, 1]} : vector<1x192xf32> to vector<1x64xf32>
    %161 = arith.addf %159, %160 : vector<1x64xf32>
    %162 = arith.negf %161 : vector<1x64xf32>
    %163 = math.exp %162 : vector<1x64xf32>
    %cst_53 = arith.constant 1.000000e+00 : f32
    %164 = vector.broadcast %cst_53 : f32 to vector<1x64xf32>
    %165 = arith.addf %164, %163 : vector<1x64xf32>
    %166 = arith.divf %164, %165 : vector<1x64xf32>
    %167 = vector.extract_strided_slice %156 {offsets = [0, 64], sizes = [1, 64], strides = [1, 1]} : vector<1x192xf32> to vector<1x64xf32>
    %168 = vector.extract_strided_slice %158 {offsets = [0, 64], sizes = [1, 64], strides = [1, 1]} : vector<1x192xf32> to vector<1x64xf32>
    %169 = arith.addf %167, %168 : vector<1x64xf32>
    %170 = arith.negf %169 : vector<1x64xf32>
    %171 = math.exp %170 : vector<1x64xf32>
    %cst_54 = arith.constant 1.000000e+00 : f32
    %172 = vector.broadcast %cst_54 : f32 to vector<1x64xf32>
    %173 = arith.addf %172, %171 : vector<1x64xf32>
    %174 = arith.divf %172, %173 : vector<1x64xf32>
    %175 = vector.extract_strided_slice %156 {offsets = [0, 128], sizes = [1, 64], strides = [1, 1]} : vector<1x192xf32> to vector<1x64xf32>
    %176 = vector.extract_strided_slice %158 {offsets = [0, 128], sizes = [1, 64], strides = [1, 1]} : vector<1x192xf32> to vector<1x64xf32>
    %177 = arith.mulf %166, %176 : vector<1x64xf32>
    %178 = arith.addf %175, %177 : vector<1x64xf32>
    %179 = math.tanh %178 : vector<1x64xf32>
    %cst_55 = arith.constant 1.000000e+00 : f32
    %180 = vector.broadcast %cst_55 : f32 to vector<1x64xf32>
    %181 = arith.subf %180, %174 : vector<1x64xf32>
    %182 = arith.mulf %181, %179 : vector<1x64xf32>
    %183 = arith.mulf %174, %122 : vector<1x64xf32>
    %184 = arith.addf %182, %183 : vector<1x64xf32>
    %185 = vector.extract_strided_slice %25 {offsets = [4, 0], sizes = [2, 192], strides = [1, 1]} : vector<6x192xf32> to vector<2x192xf32>
    %cst_56 = arith.constant dense<0.000000e+00> : vector<2x192xf32>
    %186 = tpu.matmul %152, %28, %cst_56 {dimension_numbers = #tpu.dot_dimension_numbers<[1], [0], [0], [1], [0, 0, 1, 1], [], []>} : vector<2x64xf32>, vector<64x192xf32>, vector<2x192xf32> -> vector<2x192xf32>
    %187 = vector.broadcast %29 : vector<1x192xf32> to vector<2x192xf32>
    %188 = arith.addf %186, %187 : vector<2x192xf32>
    %189 = vector.extract_strided_slice %185 {offsets = [0, 0], sizes = [2, 64], strides = [1, 1]} : vector<2x192xf32> to vector<2x64xf32>
    %190 = vector.extract_strided_slice %188 {offsets = [0, 0], sizes = [2, 64], strides = [1, 1]} : vector<2x192xf32> to vector<2x64xf32>
    %191 = arith.addf %189, %190 : vector<2x64xf32>
    %192 = arith.negf %191 : vector<2x64xf32>
    %193 = math.exp %192 : vector<2x64xf32>
    %cst_57 = arith.constant 1.000000e+00 : f32
    %194 = vector.broadcast %cst_57 : f32 to vector<2x64xf32>
    %195 = arith.addf %194, %193 : vector<2x64xf32>
    %196 = arith.divf %194, %195 : vector<2x64xf32>
    %197 = vector.extract_strided_slice %185 {offsets = [0, 64], sizes = [2, 64], strides = [1, 1]} : vector<2x192xf32> to vector<2x64xf32>
    %198 = vector.extract_strided_slice %188 {offsets = [0, 64], sizes = [2, 64], strides = [1, 1]} : vector<2x192xf32> to vector<2x64xf32>
    %199 = arith.addf %197, %198 : vector<2x64xf32>
    %200 = arith.negf %199 : vector<2x64xf32>
    %201 = math.exp %200 : vector<2x64xf32>
    %cst_58 = arith.constant 1.000000e+00 : f32
    %202 = vector.broadcast %cst_58 : f32 to vector<2x64xf32>
    %203 = arith.addf %202, %201 : vector<2x64xf32>
    %204 = arith.divf %202, %203 : vector<2x64xf32>
    %205 = vector.extract_strided_slice %185 {offsets = [0, 128], sizes = [2, 64], strides = [1, 1]} : vector<2x192xf32> to vector<2x64xf32>
    %206 = vector.extract_strided_slice %188 {offsets = [0, 128], sizes = [2, 64], strides = [1, 1]} : vector<2x192xf32> to vector<2x64xf32>
    %207 = arith.mulf %196, %206 : vector<2x64xf32>
    %208 = arith.addf %205, %207 : vector<2x64xf32>
    %209 = math.tanh %208 : vector<2x64xf32>
    %cst_59 = arith.constant 1.000000e+00 : f32
    %210 = vector.broadcast %cst_59 : f32 to vector<2x64xf32>
    %211 = arith.subf %210, %204 : vector<2x64xf32>
    %212 = arith.mulf %211, %209 : vector<2x64xf32>
    %213 = arith.mulf %204, %152 : vector<2x64xf32>
    %214 = arith.addf %212, %213 : vector<2x64xf32>
    %215 = vector.extract_strided_slice %214 {offsets = [0, 0], sizes = [1, 64], strides = [1, 1]} : vector<2x64xf32> to vector<1x64xf32>
    %216 = vector.extract_strided_slice %214 {offsets = [1, 0], sizes = [1, 64], strides = [1, 1]} : vector<2x64xf32> to vector<1x64xf32>
    %217 = tpu.concatenate %184, %215, %216 in 1 : vector<1x64xf32>, vector<1x64xf32>, vector<1x64xf32> -> vector<1x192xf32>
    %218 = tpu.concatenate %93, %155, %217 in 0 : vector<1x192xf32>, vector<1x192xf32>, vector<1x192xf32> -> vector<3x192xf32>
    %cst_60 = arith.constant 0.000000e+00 : f32
    %219 = vector.broadcast %cst_60 : f32 to vector<3x192xf32>
    %220 = arith.maximumf %218, %219 : vector<3x192xf32>
    %c0_61 = arith.constant 0 : index
    %c0_62 = arith.constant 0 : index
    %221 = vector.load %arg10[%c0_61, %c0_62] : memref<192x32xf32, #tpu.memory_space<vmem>>, vector<192x32xf32>
    %cst_63 = arith.constant dense<0.000000e+00> : vector<3x32xf32>
    %222 = tpu.matmul %220, %221, %cst_63 {dimension_numbers = #tpu.dot_dimension_numbers<[1], [0], [0], [1], [0, 0, 1, 1], [], []>} : vector<3x192xf32>, vector<192x32xf32>, vector<3x32xf32> -> vector<3x32xf32>
    %c0_64 = arith.constant 0 : index
    %c0_65 = arith.constant 0 : index
    %223 = vector.load %arg11[%c0_64, %c0_65] : memref<1x32xf32, #tpu.memory_space<vmem>>, vector<1x32xf32>
    %224 = vector.broadcast %223 : vector<1x32xf32> to vector<3x32xf32>
    %225 = arith.addf %222, %224 : vector<3x32xf32>
    %226 = vector.extract_strided_slice %225 {offsets = [2, 0], sizes = [1, 32], strides = [1, 1]} : vector<3x32xf32> to vector<1x32xf32>
    %cst_66 = arith.constant dense<0.000000e+00> : vector<1x24xf32>
    %227 = tpu.matmul %226, %13, %cst_66 {dimension_numbers = #tpu.dot_dimension_numbers<[1], [1], [0], [0], [0, 0, 1, 0], [], []>} : vector<1x32xf32>, vector<24x32xf32>, vector<1x24xf32> -> vector<1x24xf32>
    %cst_67 = arith.constant dense<0xFF800000> : vector<1xf32>
    %228 = vector.multi_reduction <maximumf>, %227, %cst_67 [1] : vector<1x24xf32> to vector<1xf32>
    %229 = vector.shape_cast %228 : vector<1xf32> to vector<1x1xf32>
    %230 = vector.broadcast %229 : vector<1x1xf32> to vector<1x24xf32>
    %231 = arith.subf %227, %230 : vector<1x24xf32>
    %232 = math.exp %231 : vector<1x24xf32>
    %cst_68 = arith.constant dense<0.000000e+00> : vector<1xf32>
    %233 = vector.multi_reduction <add>, %232, %cst_68 [1] : vector<1x24xf32> to vector<1xf32>
    %234 = vector.shape_cast %233 : vector<1xf32> to vector<1x1xf32>
    %235 = tpu.reciprocal %234 {approx = true} : vector<1x1xf32> -> vector<1x1xf32>
    %236 = vector.broadcast %235 : vector<1x1xf32> to vector<1x24xf32>
    %237 = arith.mulf %232, %236 : vector<1x24xf32>
    %cst_69 = arith.constant dense<0.000000e+00> : vector<1x32xf32>
    %238 = tpu.matmul %237, %13, %cst_69 {dimension_numbers = #tpu.dot_dimension_numbers<[1], [0], [0], [1], [0, 0, 1, 1], [], []>} : vector<1x24xf32>, vector<24x32xf32>, vector<1x32xf32> -> vector<1x32xf32>
    %239 = vector.extract_strided_slice %225 {offsets = [0, 0], sizes = [2, 32], strides = [1, 1]} : vector<3x32xf32> to vector<2x32xf32>
    %cst_70 = arith.constant dense<0.000000e+00> : vector<1x2xf32>
    %240 = tpu.matmul %226, %239, %cst_70 {dimension_numbers = #tpu.dot_dimension_numbers<[1], [1], [0], [0], [0, 0, 1, 0], [], []>} : vector<1x32xf32>, vector<2x32xf32>, vector<1x2xf32> -> vector<1x2xf32>
    %cst_71 = arith.constant dense<0xFF800000> : vector<1xf32>
    %241 = vector.multi_reduction <maximumf>, %240, %cst_71 [1] : vector<1x2xf32> to vector<1xf32>
    %242 = vector.shape_cast %241 : vector<1xf32> to vector<1x1xf32>
    %243 = vector.broadcast %242 : vector<1x1xf32> to vector<1x2xf32>
    %244 = arith.subf %240, %243 : vector<1x2xf32>
    %245 = math.exp %244 : vector<1x2xf32>
    %cst_72 = arith.constant dense<0.000000e+00> : vector<1xf32>
    %246 = vector.multi_reduction <add>, %245, %cst_72 [1] : vector<1x2xf32> to vector<1xf32>
    %247 = vector.shape_cast %246 : vector<1xf32> to vector<1x1xf32>
    %248 = tpu.reciprocal %247 {approx = true} : vector<1x1xf32> -> vector<1x1xf32>
    %249 = vector.broadcast %248 : vector<1x1xf32> to vector<1x2xf32>
    %250 = arith.mulf %245, %249 : vector<1x2xf32>
    %c0_73 = arith.constant 0 : index
    %c0_74 = arith.constant 0 : index
    %251 = vector.load %arg21[%c0_73, %c0_74] : memref<2x24xf32, #tpu.memory_space<vmem>>, vector<2x24xf32>
    %cst_75 = arith.constant dense<0.000000e+00> : vector<1x24xf32>
    %252 = tpu.matmul %250, %251, %cst_75 {dimension_numbers = #tpu.dot_dimension_numbers<[1], [0], [0], [1], [0, 0, 1, 1], [], []>} : vector<1x2xf32>, vector<2x24xf32>, vector<1x24xf32> -> vector<1x24xf32>
    %cst_76 = arith.constant dense<0.000000e+00> : vector<1x32xf32>
    %253 = tpu.matmul %252, %13, %cst_76 {dimension_numbers = #tpu.dot_dimension_numbers<[1], [0], [0], [1], [0, 0, 1, 1], [], []>} : vector<1x24xf32>, vector<24x32xf32>, vector<1x32xf32> -> vector<1x32xf32>
    %254 = tpu.concatenate %226, %238, %253 in 1 : vector<1x32xf32>, vector<1x32xf32>, vector<1x32xf32> -> vector<1x96xf32>
    %cst_77 = arith.constant 0.000000e+00 : f32
    %255 = vector.broadcast %cst_77 : f32 to vector<1x96xf32>
    %256 = arith.maximumf %254, %255 : vector<1x96xf32>
    %c0_78 = arith.constant 0 : index
    %c0_79 = arith.constant 0 : index
    %257 = vector.load %arg17[%c0_78, %c0_79] : memref<96x64xf32, #tpu.memory_space<vmem>>, vector<96x64xf32>
    %cst_80 = arith.constant dense<0.000000e+00> : vector<1x64xf32>
    %258 = tpu.matmul %256, %257, %cst_80 {dimension_numbers = #tpu.dot_dimension_numbers<[1], [0], [0], [1], [0, 0, 1, 1], [], []>} : vector<1x96xf32>, vector<96x64xf32>, vector<1x64xf32> -> vector<1x64xf32>
    %c0_81 = arith.constant 0 : index
    %c0_82 = arith.constant 0 : index
    %259 = vector.load %arg18[%c0_81, %c0_82] : memref<1x64xf32, #tpu.memory_space<vmem>>, vector<1x64xf32>
    %260 = arith.addf %258, %259 : vector<1x64xf32>
    %cst_83 = arith.constant 0.000000e+00 : f32
    %261 = vector.broadcast %cst_83 : f32 to vector<1x64xf32>
    %262 = arith.maximumf %260, %261 : vector<1x64xf32>
    %c0_84 = arith.constant 0 : index
    %c0_85 = arith.constant 0 : index
    %263 = vector.load %arg19[%c0_84, %c0_85] : memref<64x24xf32, #tpu.memory_space<vmem>>, vector<64x24xf32>
    %cst_86 = arith.constant dense<0.000000e+00> : vector<1x24xf32>
    %264 = tpu.matmul %262, %263, %cst_86 {dimension_numbers = #tpu.dot_dimension_numbers<[1], [0], [0], [1], [0, 0, 1, 1], [], []>} : vector<1x64xf32>, vector<64x24xf32>, vector<1x24xf32> -> vector<1x24xf32>
    %c0_87 = arith.constant 0 : index
    %c0_88 = arith.constant 0 : index
    %265 = vector.load %arg20[%c0_87, %c0_88] : memref<1x24xf32, #tpu.memory_space<vmem>>, vector<1x24xf32>
    %266 = arith.addf %264, %265 : vector<1x24xf32>
    %c0_89 = arith.constant 0 : index
    %c0_90 = arith.constant 0 : index
    %267 = vector.load %arg22[%c0_89, %c0_90] : memref<1x24xf32, #tpu.memory_space<vmem>>, vector<1x24xf32>
    tpu.vector_store %arg22[%c0_89, %c0_90], %266 {strides = array<i32>} : memref<1x24xf32, #tpu.memory_space<vmem>>, vector<1x24xf32>,
    return
  }
}

</mosaic_0001>

<bundles_post_ra>
// kernel: tpu_custom_call.1
= control target key start
LH: loop header
LB: loop body
LE: loop exit
PB: predicated region body
PF: predicated region fallthrough
CT: control target
= control target key end

     0   :  { %s2632_s0 = inlined_call_operand.hbm [shape: f32[3,32], index: 0, kind: input, shape index: {}]   ;;  %s2633_s1 = inlined_call_operand.vmem [shape: f32[6,32], index: 1, kind: input, shape index: {}]   ;;  %s2634_s2 = inlined_call_operand.vmem [shape: f32[32,192], index: 2, kind: input, shape index: {}]   ;;  %s2635_s3 = inlined_call_operand.vmem [shape: f32[64,192], index: 3, kind: input, shape index: {}]   ;;  %s2636_s4 = inlined_call_operand.hbm [shape: f32[1,192], index: 4, kind: input, shape index: {}]   ;;  %s2637_s5 = inlined_call_operand.hbm [shape: f32[1,192], index: 5, kind: input, shape index: {}]   ;;  %s2638_s6 = inlined_call_operand.vmem [shape: f32[32,192], index: 6, kind: input, shape index: {}]   ;;  %s2639_s7 = inlined_call_operand.vmem [shape: f32[64,192], index: 7, kind: input, shape index: {}]   ;;  %s2640_s8 = inlined_call_operand.hbm [shape: f32[1,192], index: 8, kind: input, shape index: {}]   ;;  %s2641_s9 = inlined_call_operand.hbm [shape: f32[1,192], index: 9, kind: input, shape index: {}]   ;;  %s2642_s10 = inlined_call_operand.vmem [shape: f32[192,32], index: 10, kind: input, shape index: {}]   ;;  %s2643_s11 = inlined_call_operand.hbm [shape: f32[1,32], index: 11, kind: input, shape index: {}]   ;;  %s2644_s12 = inlined_call_operand.hbm [shape: f32[24,24], index: 12, kind: input, shape index: {}]   ;;  %s2645_s13 = inlined_call_operand.hbm [shape: f32[24,32], index: 13, kind: input, shape index: {}]   ;;  %s2646_s14 = inlined_call_operand.hbm [shape: f32[1,32], index: 14, kind: input, shape index: {}]   ;;  %s2647_s15 = inlined_call_operand.hbm [shape: f32[32,32], index: 15, kind: input, shape index: {}]   ;;  %s2648_s16 = inlined_call_operand.hbm [shape: f32[1,32], index: 16, kind: input, shape index: {}]   ;;  %s2649_s17 = inlined_call_operand.vmem [shape: f32[96,64], index: 17, kind: input, shape index: {}]   ;;  %s2650_s18 = inlined_call_operand.vmem [shape: f32[1,64], index: 18, kind: input, shape index: {}]   ;;  %s2651_s19 = inlined_call_operand.vmem [shape: f32[64,24], index: 19, kind: input, shape index: {}]   ;;  %s2652_s20 = inlined_call_operand.hbm [shape: f32[1,24], index: 20, kind: input, shape index: {}]   ;;  %s2653_s21 = inlined_call_operand.hbm [shape: f32[2,24], index: 21, kind: input, shape index: {}]   ;;  %s2654_s22 = inlined_call_operand.hbm [shape: f32[1,24], index: 22, kind: output, shape index: {}]  }
   0x1   :  { %2658 = sst [smem:[#allocation32_spill]] %s2632_s0 }
   0x2   :  { %2659 = sst [smem:[#allocation33_spill]] %s2633_s1 }
   0x3   :  { %2660 = sst [smem:[#allocation34_spill]] %s2634_s2 }
   0x4   :  { %2661 = sst [smem:[#allocation35_spill]] %s2635_s3 }
   0x5   :  { %2662 = sst [smem:[#allocation36_spill]] %s2636_s4 }
   0x6   :  { %2663 = sst [smem:[#allocation37_spill]] %s2637_s5 }
   0x7   :  { %2664 = sst [smem:[#allocation38_spill]] %s2638_s6 }
   0x8   :  { %27 = vsyncpa [#allocation3], 0 }
   0x9   :  { %28 = vsyncpa [#allocation6], 0 }
   0xa   :  { %29 = vsyncpa [#allocation9], 0 }
   0xb   :  { %30 = vsyncpa [#allocation12], 0 }
   0xc   :  { %31 = vsyncpa [#allocation15], 0 }
   0xd   :  { %32 = vsyncpa [#allocation18], 0 }
   0xe   :  { %33 = vsyncpa [#allocation21], 0  ;;  %s2665_s29 = sld [smem:[#allocation36_spill]] }
  0x14   :  { %s57_s30 = sshll.u32 %s2665_s29, 4  ;;  %s58_s30 = int_to_ptr.hbm [resolvable:$true] %s57_s30 }
  0x15   :  { %34 = vsyncpa [#allocation4], 0  ;;  %s1849_s4 = smov [#allocation5]   ;;  %s83_s5 = sshll.u32 %s2640_s8, 4  ;;  %s84_s5 = int_to_ptr.hbm [resolvable:$true] %s83_s5 }
  0x16   :  { %s59_s0 = sshll.u32 %s1849_s4, 4  ;;  %s1850_s24 = smov [#allocation8]   ;;  %s60_s0 = int_to_ptr.vmem [resolvable:$true] %s59_s0 }
  0x17   :  { %62 = dma.hbm_to_vmem [thread:$0]  %s58_s30, 32, %s60_s0, [#allocation6]  }
  0x18   :  { %s85_s6 = sshll.u32 %s1850_s24, 4  ;;  %s107_s2 = sshll.u32 %s2643_s11, 4  ;;  %s86_s6 = int_to_ptr.vmem [resolvable:$true] %s85_s6  ;;  %s108_s2 = int_to_ptr.hbm [resolvable:$true] %s107_s2 }
  0x19   :  { %88 = dma.hbm_to_vmem [thread:$0]  %s84_s5, 32, %s86_s6, [#allocation9]  }
  0x1a   :  { %s1851_s27 = smov [#allocation11]   ;;  %s130_s4 = sshll.u32 %s2645_s13, 4  ;;  %s131_s4 = int_to_ptr.hbm [resolvable:$true] %s130_s4 }
  0x1b   :  { %s109_s3 = sshll.u32 %s1851_s27, 4  ;;  %s1852_s8 = smov [#allocation14]   ;;  %s110_s3 = int_to_ptr.vmem [resolvable:$true] %s109_s3 }
  0x1c   :  { %112 = dma.hbm_to_vmem [thread:$0]  %s108_s2, 16, %s110_s3, [#allocation12]  }
  0x1d   :  { %s132_s30 = sshll.u32 %s1852_s8, 4  ;;  %s154_s1 = sshll.u32 %s2647_s15, 4  ;;  %s133_s30 = int_to_ptr.vmem [resolvable:$true] %s132_s30  ;;  %s155_s1 = int_to_ptr.hbm [resolvable:$true] %s154_s1 }
  0x1e   :  { %s1853_s11 = smov 128   ;;  %s1854_s24 = smov 8  }
  0x1f   :  { %138 = dma.hbm_to_vmem [thread:$0]  %s131_s4, 384, %s133_s30, [#allocation15], %s1853_s11, %s1853_s11, %s1854_s24  }
  0x20   :  { %s185_s13 = sshll.u32 %s2652_s20, 4  ;;  %s1855_s25 = smov [#allocation17]   ;;  %s186_s13 = int_to_ptr.hbm [resolvable:$true] %s185_s13 }
  0x21   :  { %s156_s26 = sshll.u32 %s1855_s25, 4  ;;  %s1856_s15 = smov [#allocation20]   ;;  %s157_s26 = int_to_ptr.vmem [resolvable:$true] %s156_s26 }
  0x22   :  { %162 = dma.hbm_to_vmem [thread:$0]  %s155_s1, 512, %s157_s26, [#allocation18], %s1853_s11, %s1853_s11, %s1854_s24  }
  0x23   :  { %s187_s2 = sshll.u32 %s1856_s15, 4  ;;  %s2666_s28 = sld [smem:[#allocation32_spill]]  ;;  %s188_s2 = int_to_ptr.vmem [resolvable:$true] %s187_s2 }
  0x24   :  { %190 = dma.hbm_to_vmem [thread:$0]  %s186_s13, 16, %s188_s2, [#allocation21]  }
  0x25   :  { %s2667_s20 = sld [smem:[#allocation37_spill]]  ;;  %s1857_s0 = smov [#allocation2]  }
  0x26   :  { %s42_s23 = sshll.u32 %s1857_s0, 4  ;;  %s1858_s5 = smov [#allocation7]   ;;  %s43_s23 = int_to_ptr.vmem [resolvable:$true] %s42_s23 }
  0x27   :  { %s70_s1 = sshll.u32 %s1858_s5, 4  ;;  %s94_s26 = sshll.u32 %s2641_s9, 4  ;;  %s71_s1 = int_to_ptr.vmem [resolvable:$true] %s70_s1  ;;  %s95_s26 = int_to_ptr.hbm [resolvable:$true] %s94_s26 }
  0x28   :  { %s117_s2 = sshll.u32 %s2644_s12, 4  ;;  %s1859_s27 = smov [#allocation10]   ;;  %s118_s2 = int_to_ptr.hbm [resolvable:$true] %s117_s2 }
  0x29   :  { %s40_s29 = sshll.u32 %s2666_s28, 4  ;;  %s96_s3 = sshll.u32 %s1859_s27, 4  ;;  %s41_s29 = int_to_ptr.hbm [resolvable:$true] %s40_s29  ;;  %s97_s3 = int_to_ptr.vmem [resolvable:$true] %s96_s3 }
  0x2a   :  { %45 = dma.hbm_to_vmem [thread:$0]  %s41_s29, 64, %s43_s23, [#allocation3]  }
  0x2b   :  { %s68_s30 = sshll.u32 %s2667_s20, 4  ;;  %s1860_s28 = smov [#allocation13]   ;;  %s69_s30 = int_to_ptr.hbm [resolvable:$true] %s68_s30 }
  0x2c   :  { %73 = dma.hbm_to_vmem [thread:$0]  %s69_s30, 32, %s71_s1, [#allocation6]  }
  0x2d   :  { %99 = dma.hbm_to_vmem [thread:$0]  %s95_s26, 32, %s97_s3, [#allocation9]  }
  0x2e   :  { %s119_s29 = sshll.u32 %s1860_s28, 4  ;;  %s144_s20 = sshll.u32 %s2646_s14, 4  ;;  %s120_s29 = int_to_ptr.vmem [resolvable:$true] %s119_s29  ;;  %s145_s20 = int_to_ptr.hbm [resolvable:$true] %s144_s20 }
  0x2f   :  { %125 = dma.hbm_to_vmem [thread:$0]  %s118_s2, 384, %s120_s29, [#allocation12], %s1853_s11, %s1853_s11, %s1854_s24  }
  0x30   :  { %s168_s12 = sshll.u32 %s2648_s16, 4  ;;  %s1861_s0 = smov [#allocation16]   ;;  %s169_s12 = int_to_ptr.hbm [resolvable:$true] %s168_s12 }
  0x31   :  { %s146_s23 = sshll.u32 %s1861_s0, 4  ;;  %s1862_s5 = smov [#allocation19]   ;;  %s147_s23 = int_to_ptr.vmem [resolvable:$true] %s146_s23 }
  0x32   :  { %149 = dma.hbm_to_vmem [thread:$0]  %s145_s20, 16, %s147_s23, [#allocation15]  }
  0x33   :  { %s170_s1 = sshll.u32 %s1862_s5, 4  ;;  %s196_s14 = sshll.u32 %s2653_s21, 4  ;;  %s171_s1 = int_to_ptr.vmem [resolvable:$true] %s170_s1  ;;  %s197_s14 = int_to_ptr.hbm [resolvable:$true] %s196_s14 }
  0x34   :  { %173 = dma.hbm_to_vmem [thread:$0]  %s169_s12, 16, %s171_s1, [#allocation18]  }
  0x35   :  { %s1863_s26 = smov [#allocation22]  }
  0x36   :  { %s198_s11 = sshll.u32 %s1863_s26, 4  ;;  %s199_s11 = int_to_ptr.vmem [resolvable:$true] %s198_s11 }
  0x37   :  { %201 = dma.hbm_to_vmem [thread:$0]  %s197_s14, 32, %s199_s11, [#allocation21]  }
  0x38   :  { %1833 = dma.done.wait [#allocation3], 64  }
  0x39   :  { %1834 = vsyncadd [#allocation3], 4294967232 }
  0x3a   :  { %1835 = dma.done.wait [#allocation6], 64  }
  0x3b   :  { %1836 = vsyncadd [#allocation6], 4294967232 }
  0x3c   :  { %1837 = dma.done.wait [#allocation9], 64  }
  0x3d   :  { %1838 = vsyncadd [#allocation9], 4294967232 }
  0x3e   :  { %1839 = dma.done.wait [#allocation12], 400  }
  0x3f   :  { %1840 = vsyncadd [#allocation12], 4294966896 }
  0x40   :  { %1841 = dma.done.wait [#allocation15], 400  }
  0x41   :  { %1842 = vsyncadd [#allocation15], 4294966896 }
  0x42   :  { %1843 = dma.done.wait [#allocation18], 528  }
  0x43   :  { %1844 = vsyncadd [#allocation18], 4294966768 }
  0x44   :  { %1845 = dma.done.wait [#allocation21], 48  }
  0x45   :  { %1846 = vsyncadd [#allocation21], 4294967248  ;;  %v259_v0 = vld [vmem:[#allocation14 + $0x10] sm:$0xff]  ;;  %v258_v1 = vld [vmem:[#allocation14 + $0x8] sm:$0xff]  ;;  %vm264_vm0 = vcmask 195584   ;;  %s2668_s24 = sld [smem:[#allocation34_spill]] }
  0x46   :  { %287 = vmatpush.msra.mxu0 %v259_v0  ;;  %v257_v2 = vld [vmem:[#allocation14] sm:$0xff]  ;;  %v306_v3 = vld [vmem:[#allocation17 + $0x18] sm:$0xff]  ;;  %v2031_v4 = vld [vmem:[#allocation13] sm:$0xff]  ;;  %vm307_vm1 = vcmask 261120   ;;  %s2669_s1 = sld [smem:[#allocation38_spill]]  ;;  %v1864_v42 = vmov 0.0  }
  0x47   :  { %1422 = vmatpush.msra.mxu1 %v306_v3  ;;  %v2035_v5 = vld [vmem:[#allocation13 + $0x8] sm:$0xff]  ;;  %v2039_v6 = vld [vmem:[#allocation13 + $0x10] sm:$0xff]  ;;  %v304_v8 = vld [vmem:[#allocation17 + $0x8] sm:$0xff]  ;;  %s2670_s8 = sld [smem:[#allocation33_spill]]  ;;  %vm528_vm10 = vcmask 523264   ;;  %s1867_s12 = smov [#allocation23]  }
  0x48   :  { %288 = vmatpush.msra.mxu0 %v258_v1  ;;  %v305_v7 = vld [vmem:[#allocation17 + $0x10] sm:$0xff]  ;;  %v303_v9 = vld [vmem:[#allocation17] sm:$0xff]  ;;  %v1450_v12 = vld [vmem:[#allocation16] ss:$0 sm:$0xff]  ;;  %s2671_s13 = sld [smem:[#allocation35_spill]]  ;;  %s1364_s0 = sshll.u32 %s1867_s12, 4  ;;  %s1365_s0 = int_to_ptr.vmem [resolvable:$true] %s1364_s0 }
  0x49   :  { %1423 = vmatpush.msra.mxu1 %v305_v7  ;;  %v373_v27 = vld [vmem:[#allocation2] sm:$0x7]  ;;  %v520_v33 = vld [vmem:[%s2639_s7 + $0x70] sm:$0xff]  ;;  %v2163_v51 = vld [vmem:[%s2639_s7 + $0x78] sm:$0xff]  ;;  %s1366_s6 = sshll.u32 %s2654_s22, 4  ;;  %s1367_s6 = int_to_ptr.hbm [resolvable:$true] %s1366_s6 }
  0x4a   :  { %289 = vmatpush.msra.mxu0 %v257_v2  ;;  %v518_v34 = vld [vmem:[%s2639_s7 + $0x60] sm:$0xff]  ;;  %v2093_v35 = vld [vmem:[%s2639_s7 + $0x50] sm:$0xff]  ;;  %v2174_v54 = vld [vmem:[%s2639_s7 + $0x68] sm:$0xff] }
  0x4b   :  { %1382 = vmatmul.msk.f32.vlgmr.msra.gmra.mxu0 %vm264_vm0, %v2031_v4  ;;  %1424 = vmatpush.msra.mxu1 %v304_v8  ;;  %v380_v10 = vld [vmem:[%s2668_s24 + $0x30] sm:$0xff]  ;;  %v378_v11 = vld [vmem:[%s2668_s24 + $0x20] sm:$0xff]  ;;  %v381_v24 = vld [vmem:[%s2668_s24 + $0x38] sm:$0xff] }
  0x4c   :  { %329 = vmatpush.msrb.mxu0 %v306_v3  ;;  %403 = vmatpush.msra.mxu3 %v380_v10  ;;  %v376_v22 = vld [vmem:[%s2668_s24 + $0x10] sm:$0xff]  ;;  %v374_v23 = vld [vmem:[%s2668_s24] sm:$0xff]  ;;  %v379_v25 = vld [vmem:[%s2668_s24 + $0x28] sm:$0xff] }
  0x4d   :  { %1425 = vmatpush.msra.mxu1 %v303_v9  ;;  %v377_v26 = vld [vmem:[%s2668_s24 + $0x18] sm:$0xff]  ;;  %v375_v28 = vld [vmem:[%s2668_s24 + $0x8] sm:$0xff]  ;;  %v438_v29 = vld [vmem:[%s2669_s1 + $0x30] sm:$0xff] }
  0x4e   :  { %330 = vmatpush.msrb.mxu0 %v305_v7  ;;  %404 = vmatpush.msra.mxu3 %v378_v11  ;;  %v436_v30 = vld [vmem:[%s2669_s1 + $0x20] sm:$0xff]  ;;  %v434_v31 = vld [vmem:[%s2669_s1 + $0x10] sm:$0xff]  ;;  %v439_v44 = vld [vmem:[%s2669_s1 + $0x38] sm:$0xff] }
  0x4f   :  { %v432_v32 = vld [vmem:[%s2669_s1] sm:$0xff]  ;;  %v2107_v38 = vld [vmem:[%s2639_s7 + $0x30] sm:$0xff]  ;;  %v437_v45 = vld [vmem:[%s2669_s1 + $0x28] sm:$0xff] }
  0x50   :  { %331 = vmatpush.msrb.mxu0 %v304_v8  ;;  %405 = vmatpush.msra.mxu3 %v376_v22  ;;  %v2098_v36 = vld [vmem:[%s2639_s7 + $0x40] sm:$0xff]  ;;  %v2121_v40 = vld [vmem:[%s2639_s7 + $0x10] sm:$0xff]  ;;  %v435_v47 = vld [vmem:[%s2669_s1 + $0x18] sm:$0xff] }
  0x51   :  { %v431_v37 = vld [vmem:[%s2670_s8] sm:$0x3f]  ;;  %v2148_v48 = vld [vmem:[%s2671_s13 + $0x78] sm:$0xff]  ;;  %v433_v49 = vld [vmem:[%s2669_s1 + $0x8] sm:$0xff] }
  0x52   :  { %332 = vmatpush.msrb.mxu0 %v303_v9  ;;  %406 = vmatpush.msra.mxu3 %v374_v23  ;;  %v2114_v39 = vld [vmem:[%s2639_s7 + $0x20] sm:$0xff]  ;;  %v2157_v50 = vld [vmem:[%s2671_s13 + $0x68] sm:$0xff]  ;;  %v2168_v53 = vld [vmem:[%s2671_s13 + $0x70] sm:$0xff] }
  0x53   :  { %1383 = vmatmul.msk.f32.gmra.mxu0 %vm264_vm0, %v2035_v5  ;;  %1391 = vmatmul.msk.f32.vlgmr.msra.gmra.mxu3 %vm307_vm1, %v373_v27  ;;  %v2126_v41 = vld [vmem:[%s2639_s7] sm:$0xff]  ;;  %v2179_v55 = vld [vmem:[%s2671_s13 + $0x58] sm:$0xff]  ;;  %v2199_v58 = vld [vmem:[%s2671_s13 + $0x48] sm:$0xff] }
  0x54   :  { %423 = vmatpush.msrb.mxu3 %v381_v24  ;;  %481 = vmatpush.msra.mxu0 %v439_v44  ;;  %v2186_v56 = vld [vmem:[%s2671_s13 + $0x60] sm:$0xff]  ;;  %v2193_v57 = vld [vmem:[%s2639_s7 + $0x58] sm:$0xff]  ;;  %v2204_v59 = vld [vmem:[%s2671_s13 + $0x50] sm:$0xff] }
  0x55   :  { %560 = vmatpush.msrb.mxu1 %v2148_v48  ;;  %v2212_v60 = vld [vmem:[%s2639_s7 + $0x48] sm:$0xff]  ;;  %v2217_v61 = vld [vmem:[%s2671_s13 + $0x38] sm:$0xff]  ;;  %v2222_v62 = vld [vmem:[%s2671_s13 + $0x40] sm:$0xff] }
  0x56   :  { %424 = vmatpush.msrb.mxu3 %v379_v25  ;;  %482 = vmatpush.msra.mxu0 %v437_v45  ;;  %v2230_v63 = vld [vmem:[%s2639_s7 + $0x38] sm:$0xff]  ;;  %v2236_v0 = vld [vmem:[%s2671_s13 + $0x30] sm:$0xff]  ;;  %v2243_v1 = vld [vmem:[%s2671_s13 + $0x28] sm:$0xff] }
  0x57   :  { %561 = vmatpush.msrb.mxu1 %v2157_v50  ;;  %v2249_v2 = vld [vmem:[%s2639_s7 + $0x28] sm:$0xff]  ;;  %v2257_v3 = vld [vmem:[%s2671_s13 + $0x20] sm:$0xff]  ;;  %v509_v7 = vld [vmem:[%s2639_s7 + $0x18] sm:$0xff] }
  0x58   :  { %425 = vmatpush.msrb.mxu3 %v377_v26  ;;  %483 = vmatpush.msra.mxu0 %v435_v47  ;;  %v2277_v8 = vld [vmem:[%s2671_s13 + $0x8] sm:$0xff]  ;;  %v489_v10 = vld [vmem:[%s2671_s13] sm:$0xff] }
  0x59   :  { %562 = vmatpush.msrb.mxu1 %v2179_v55  ;;  %v507_v9 = vld [vmem:[%s2639_s7 + $0x8] sm:$0xff]  ;;  %v382_v25 = vld [vmem:[#allocation5] sm:$0x3]  ;;  %v505_v26 = vld [vmem:[#allocation7] sm:$0x3]  ;;  %s1865_s7 = smov 64  }
  0x5a   :  { %426 = vmatpush.msrb.mxu3 %v375_v28  ;;  %484 = vmatpush.msra.mxu0 %v433_v49  ;;  %v2354_v28 = vperm.slane %v505_v26, 0  ;;  %v2360_v45 = vperm.slane %v505_v26, 1 }
  0x5b   :  { %1384 = vmatmul.msk.f32.gmra.mxu0 %vm264_vm0, %v2039_v6  ;;  %1392 = vmatmul.msk.f32.vlgmr.msrb.gmra.mxu3 %vm307_vm1, %v373_v27  ;;  %v384_v27 = vperm.slane %v382_v25, 0 }
  0x5c   :  { %461 = vmatpush.msra.mxu3 %v438_v29  ;;  %563 = vmatpush.msrb.mxu1 %v2199_v58 }
  0x5e   :  { %462 = vmatpush.msra.mxu3 %v436_v30  ;;  %564 = vmatpush.msrb.mxu1 %v2217_v61 }
  0x60   :  { %463 = vmatpush.msra.mxu3 %v434_v31  ;;  %565 = vmatpush.msrb.mxu1 %v2243_v1 }
  0x62   :  { %464 = vmatpush.msra.mxu3 %v432_v32 }
  0x63   :  { %1393 = vmatmul.msk.f32.vlgmr.msra.gmra.mxu3 %vm307_vm1, %v431_v37 }
  0x64   :  { %616 = vmatpush.msrb.mxu3 %v520_v33 }
  0x66   :  { %617 = vmatpush.msrb.mxu3 %v518_v34 }
  0x68   :  { %618 = vmatpush.msrb.mxu3 %v2093_v35 }
  0x6a   :  { %619 = vmatpush.msrb.mxu3 %v2098_v36 }
  0x6c   :  { %620 = vmatpush.msrb.mxu3 %v2107_v38 }
  0x6e   :  { %621 = vmatpush.msrb.mxu3 %v2114_v39 }
  0x70   :  { %622 = vmatpush.msrb.mxu3 %v2121_v40 }
  0x72   :  { %623 = vmatpush.msrb.mxu3 %v2126_v41 }
  0x73   :  { %624 = vmatmul.f32.vlgmr.msrb.gmra.mxu3 %v1864_v42 }
  0x74   :  { %782 = vmatpush.msra.mxu3 %v520_v33 }
  0x76   :  { %783 = vmatpush.msra.mxu3 %v518_v34 }
  0x78   :  { %784 = vmatpush.msra.mxu3 %v2093_v35 }
  0x7a   :  { %785 = vmatpush.msra.mxu3 %v2098_v36 }
  0x7c   :  { %786 = vmatpush.msra.mxu3 %v2107_v38 }
  0x7e   :  { %787 = vmatpush.msra.mxu3 %v2114_v39 }
  0x80   :  { %788 = vmatpush.msra.mxu3 %v2121_v40 }
  0x82   :  { %789 = vmatpush.msra.mxu3 %v2126_v41 }
  0x84   :  { %959 = vmatpush.msrb.mxu3 %v520_v33 }
  0x86   :  { %960 = vmatpush.msrb.mxu3 %v518_v34 }
  0x88   :  { %961 = vmatpush.msrb.mxu3 %v2093_v35 }
  0x8a   :  { %962 = vmatpush.msrb.mxu3 %v2098_v36 }
  0x8c   :  { %963 = vmatpush.msrb.mxu3 %v2107_v38 }
  0x8e   :  { %964 = vmatpush.msrb.mxu3 %v2114_v39 }
  0x90   :  { %965 = vmatpush.msrb.mxu3 %v2121_v40 }
  0x92   :  { %966 = vmatpush.msrb.mxu3 %v2126_v41 }
  0xc8   :  { %v291_v13 = vpop.f32.mrf.mxu0 }
  0xc9   :  { %v292_v14 = vadd.f32 %v1450_v12, %v291_v13  ;;  %v2339_v13 = vld [vmem:[#allocation8] sm:$0x3] }
  0xcb   :  { %v300_v15 = vmax.f32 %v292_v14, 0.0  ;;  %v522_v14 = vld [vmem:[#allocation10] sm:$0x3] }
  0xcd   :  { %1385 = vmatmul.msk.f32.vlgmr.msrb.gmra.mxu0 %vm307_vm1, %v300_v15 }
  0xce   :  { %636 = vmatpush.msrb.mxu0 %v2163_v51 }
  0xd0   :  { %v294_v16 = vpop.f32.mrf.mxu0  ;;  %637 = vmatpush.msrb.mxu0 %v2174_v54 }
  0xd1   :  { %v295_v17 = vadd.f32 %v1450_v12, %v294_v16  ;;  %v442_v16 = vperm.slane %v2339_v13, 0 }
  0xd2   :  { %638 = vmatpush.msrb.mxu0 %v2193_v57 }
  0xd3   :  { %v301_v18 = vmax.f32 %v295_v17, 0.0  ;;  %v2344_v17 = vperm.slane %v522_v14, 0 }
  0xd4   :  { %639 = vmatpush.msrb.mxu0 %v2212_v60 }
  0xd5   :  { %1386 = vmatmul.msk.f32.vlgmr.msra.gmra.mxu1 %vm307_vm1, %v301_v18  ;;  %1394 = vmatmul.msk.f32.vlgmr.msra.gmra.mxu0 %vm307_vm1, %v431_v37 }
  0xd6   :  { %640 = vmatpush.msrb.mxu0 %v2230_v63 }
  0xd8   :  { %v297_v19 = vpop.f32.mrf.mxu0  ;;  %641 = vmatpush.msrb.mxu0 %v2249_v2 }
  0xd9   :  { %v298_v20 = vadd.f32 %v1450_v12, %v297_v19 }
  0xda   :  { %642 = vmatpush.msrb.mxu0 %v509_v7 }
  0xdb   :  { %v302_v21 = vmax.f32 %v298_v20, 0.0 }
  0xdc   :  { %643 = vmatpush.msrb.mxu0 %v507_v9 }
  0xdd   :  { %1387 = vmatmul.msk.f32.gmra.mxu1 %vm307_vm1, %v302_v21  ;;  %644 = vmatmul.f32.vlgmr.msrb.gmra.mxu0 %v1864_v42 }
  0xde   :  { %802 = vmatpush.msra.mxu0 %v2163_v51 }
  0xe0   :  { %803 = vmatpush.msra.mxu0 %v2174_v54 }
  0xe2   :  { %804 = vmatpush.msra.mxu0 %v2193_v57 }
  0xe4   :  { %805 = vmatpush.msra.mxu0 %v2212_v60 }
  0xe6   :  { %806 = vmatpush.msra.mxu0 %v2230_v63 }
  0xe8   :  { %807 = vmatpush.msra.mxu0 %v2249_v2 }
  0xea   :  { %808 = vmatpush.msra.mxu0 %v509_v7 }
  0xec   :  { %809 = vmatpush.msra.mxu0 %v507_v9 }
  0xee   :  { %979 = vmatpush.msrb.mxu0 %v2163_v51 }
  0xf0   :  { %980 = vmatpush.msrb.mxu0 %v2174_v54  ;;  %v385_v54 = vperm.slane %v382_v25, 1 }
  0xf2   :  { %981 = vmatpush.msrb.mxu0 %v2193_v57 }
  0xf4   :  { %982 = vmatpush.msrb.mxu0 %v2212_v60 }
  0xf6   :  { %983 = vmatpush.msrb.mxu0 %v2230_v63 }
  0xf8   :  { %984 = vmatpush.msrb.mxu0 %v2249_v2  ;;  %v443_v2 = vperm.slane %v2339_v13, 1 }
  0xfa   :  { %985 = vmatpush.msrb.mxu0 %v509_v7 }
  0xfc   :  { %986 = vmatpush.msrb.mxu0 %v507_v9 }
 0x14a   :  { %v334_v52 = vpop.f32.mrf.mxu0 }
 0x152   :  { %v337_v43 = vpop.f32.mrf.mxu1  ;;  %v486_v41 = vpop.f32.mrf.mxu0 }
 0x15a   :  { %v340_v46 = vpop.f32.mrf.mxu1 }
 0x15b   :  { %360 = vmatpush.msra.mxu2 %v340_v46 }
 0x15d   :  { %361 = vmatpush.msra.mxu2 %v337_v43 }
 0x15f   :  { %362 = vmatpush.msra.mxu2 %v334_v52 }
 0x160   :  { %1388 = vmatmul.msk.f32.vlgmr.msra.gmra.mxu2 %vm264_vm0, %v2031_v4  ;;  %v2263_v4 = vld [vmem:[%s2671_s13 + $0x18] sm:$0xff] }
 0x161   :  { %540 = vmatpush.msrb.mxu2 %v2168_v53  ;;  %566 = vmatpush.msrb.mxu1 %v2263_v4 }
 0x163   :  { %541 = vmatpush.msrb.mxu2 %v2186_v56  ;;  %567 = vmatpush.msrb.mxu1 %v2277_v8 }
 0x164   :  { %568 = vmatmul.f32.vlgmr.msrb.gmra.mxu1 %v1864_v42 }
 0x165   :  { %542 = vmatpush.msrb.mxu2 %v2204_v59  ;;  %719 = vmatpush.msra.mxu1 %v2148_v48 }
 0x167   :  { %543 = vmatpush.msrb.mxu2 %v2222_v62  ;;  %720 = vmatpush.msra.mxu1 %v2157_v50 }
 0x168   :  { %1389 = vmatmul.msk.f32.gmra.mxu2 %vm264_vm0, %v2035_v5  ;;  %v491_v5 = vld [vmem:[%s2671_s13 + $0x10] sm:$0xff] }
 0x169   :  { %544 = vmatpush.msrb.mxu2 %v2236_v0  ;;  %721 = vmatpush.msra.mxu1 %v2179_v55 }
 0x16b   :  { %545 = vmatpush.msrb.mxu2 %v2257_v3  ;;  %722 = vmatpush.msra.mxu1 %v2199_v58 }
 0x16d   :  { %546 = vmatpush.msrb.mxu2 %v491_v5  ;;  %723 = vmatpush.msra.mxu1 %v2217_v61 }
 0x16f   :  { %547 = vmatpush.msrb.mxu2 %v489_v10  ;;  %724 = vmatpush.msra.mxu1 %v2243_v1 }
 0x170   :  { %1390 = vmatmul.msk.f32.gmra.mxu2 %vm264_vm0, %v2039_v6  ;;  %v408_v6 = vpop.f32.mrf.mxu3 }
 0x171   :  { %699 = vmatpush.msra.mxu2 %v2168_v53  ;;  %725 = vmatpush.msra.mxu1 %v2263_v4  ;;  %v2356_v31 = vadd.f32 %v408_v6, %v384_v27 }
 0x173   :  { %700 = vmatpush.msra.mxu2 %v2186_v56  ;;  %726 = vmatpush.msra.mxu1 %v2277_v8 }
 0x175   :  { %701 = vmatpush.msra.mxu2 %v2204_v59  ;;  %898 = vmatpush.msrb.mxu1 %v2148_v48 }
 0x177   :  { %702 = vmatpush.msra.mxu2 %v2222_v62  ;;  %899 = vmatpush.msrb.mxu1 %v2157_v50 }
 0x178   :  { %548 = vmatmul.f32.vlgmr.msrb.gmra.mxu2 %v1864_v42  ;;  %v2337_v11 = vpop.f32.mrf.mxu3 }
 0x179   :  { %703 = vmatpush.msra.mxu2 %v2236_v0  ;;  %900 = vmatpush.msrb.mxu1 %v2179_v55 }
 0x17b   :  { %704 = vmatpush.msra.mxu2 %v2257_v3  ;;  %901 = vmatpush.msrb.mxu1 %v2199_v58 }
 0x17d   :  { %705 = vmatpush.msra.mxu2 %v491_v5  ;;  %902 = vmatpush.msrb.mxu1 %v2217_v61 }
 0x17f   :  { %706 = vmatpush.msra.mxu2 %v489_v10  ;;  %903 = vmatpush.msrb.mxu1 %v2243_v1  ;;  %v2372_v1 = vadd.f32 %v2337_v11, %v385_v54 }
 0x180   :  { %v466_v12 = vpop.f32.mrf.mxu3 }
 0x181   :  { %878 = vmatpush.msrb.mxu2 %v2168_v53  ;;  %904 = vmatpush.msrb.mxu1 %v2263_v4  ;;  %v2346_v19 = vadd.f32 %v466_v12, %v442_v16 }
 0x183   :  { %879 = vmatpush.msrb.mxu2 %v2186_v56  ;;  %905 = vmatpush.msrb.mxu1 %v2277_v8  ;;  %v2366_v56 = vperm.slane %v522_v14, 1  ;;  %v2377_v8 = vadd.f32 %v486_v41, %v443_v2 }
 0x185   :  { %880 = vmatpush.msrb.mxu2 %v2204_v59  ;;  %v645_v59 = vpop.f32.mrf.mxu0 }
 0x187   :  { %881 = vmatpush.msrb.mxu2 %v2222_v62 }
 0x188   :  { %v625_v18 = vpop.f32.mrf.mxu3 }
 0x189   :  { %882 = vmatpush.msrb.mxu2 %v2236_v0  ;;  %v626_v20 = vadd.f32 %v625_v18, %v2344_v17 }
 0x18b   :  { %883 = vmatpush.msrb.mxu2 %v2257_v3  ;;  %v648_v22 = vadd.f32 %v626_v20, %v2346_v19  ;;  %v646_v3 = vadd.f32 %v645_v59, %v2366_v56 }
 0x18d   :  { %884 = vmatpush.msrb.mxu2 %v491_v5  ;;  %v1396_v23 = vmul.f32 -1.442695, %v648_v22 }
 0x18f   :  { %885 = vmatpush.msrb.mxu2 %v489_v10  ;;  %1453 = vpow2.f32 %v1396_v23 }
 0x195   :  { %v1454_v29 = vpop.eup %1453 }
 0x196   :  { %v652_v32 = vadd.f32 1.0, %v1454_v29  ;;  %v1451_v29 = vld [vmem:[#allocation19] ss:$0 sm:$0xff] }
 0x198   :  { %1455 = vrcp.f32 %v652_v32  ;;  %vm658_vm2 = vweird.f32 %v652_v32  ;;  %v664_v48 = vand.u32 2147483648, %v652_v32  ;;  %v662_v51 = vand.u32 2147483647, %v652_v32 }
 0x19a   :  { %v665_v60 = vor.u32 1.1754944e-38, %v664_v48  ;;  %vm663_vm8 = vcmp.eq.f32.partialorder %v662_v51, 8.507059e+37 }
 0x19e   :  { %v1456_v36 = vpop.eup %1455 }
 0x19f   :  { %v654_v39 = vmul.f32 %v1456_v36, %v652_v32  ;;  %vm659_vm3 = vweird.f32 %v1456_v36 }
 0x1a0   :  { %vm2362_vm5 = vmor %vm658_vm2, %vm659_vm3 }
 0x1a1   :  { %v655_v40 = vsub.f32 1.0, %v654_v39 }
 0x1a3   :  { %v656_v43 = vmul.f32 %v1456_v36, %v655_v40 }
 0x1a5   :  { %v657_v47 = vadd.f32 %v1456_v36, %v656_v43 }
 0x1a7   :  { %v661_v62 = vsel %vm2362_vm5, %v1456_v36, %v657_v47 }
 0x1a8   :  { %v666_v7 = vsel %vm663_vm8, %v665_v60, %v661_v62 }
 0x1a9   :  { %v668_v9 = vmul.f32 %v666_v7, %v646_v3  ;;  %v671_v20 = vsub.f32 1.0, %v666_v7  ;;  %v677_v23 = vmul.f32 0.0, %v666_v7 }
 0x1ab   :  { %v669_v10 = vadd.f32 %v668_v9, %v2377_v8 }
 0x1e1   :  { %v569_v49 = vpop.f32.mrf.mxu1 }
 0x1e2   :  { %v570_v57 = vadd.f32 %v569_v49, %v2360_v45 }
 0x1e3   :  { %v2341_v15 = vpop.f32.mrf.mxu2 }
 0x1eb   :  { %v2349_v21 = vpop.f32.mrf.mxu2 }
 0x1f3   :  { %v2352_v24 = vpop.f32.mrf.mxu2 }
 0x1fb   :  { %v549_v30 = vpop.f32.mrf.mxu2 }
 0x1fc   :  { %v550_v33 = vadd.f32 %v549_v30, %v2354_v28  ;;  %v2397_v30 = vadd.f32 %v1451_v29, %v2352_v24 }
 0x1fe   :  { %v572_v34 = vadd.f32 %v550_v33, %v2356_v31  ;;  %v2402_v33 = vadd.f32 %v1451_v29, %v2349_v21 }
 0x200   :  { %v1395_v35 = vmul.f32 -1.442695, %v572_v34  ;;  %v2408_v34 = vadd.f32 %v1451_v29, %v2341_v15 }
 0x202   :  { %1457 = vpow2.f32 %v1395_v35 }
 0x208   :  { %v1458_v37 = vpop.eup %1457 }
 0x209   :  { %v576_v38 = vadd.f32 1.0, %v1458_v37 }
 0x20b   :  { %1459 = vrcp.f32 %v576_v38  ;;  %v588_v50 = vand.u32 2147483648, %v576_v38  ;;  %v586_v53 = vand.u32 2147483647, %v576_v38  ;;  %vm582_vm6 = vweird.f32 %v576_v38 }
 0x20d   :  { %v589_v61 = vor.u32 1.1754944e-38, %v588_v50  ;;  %vm587_vm9 = vcmp.eq.f32.partialorder %v586_v53, 8.507059e+37 }
 0x211   :  { %v1460_v42 = vpop.eup %1459 }
 0x212   :  { %v578_v44 = vmul.f32 %v1460_v42, %v576_v38  ;;  %vm583_vm4 = vweird.f32 %v1460_v42 }
 0x213   :  { %vm584_vm7 = vmor %vm582_vm6, %vm583_vm4 }
 0x214   :  { %v579_v46 = vsub.f32 1.0, %v578_v44 }
 0x216   :  { %v580_v52 = vmul.f32 %v1460_v42, %v579_v46 }
 0x218   :  { %v581_v58 = vadd.f32 %v1460_v42, %v580_v52 }
 0x21a   :  { %v585_v63 = vsel %vm584_vm7, %v1460_v42, %v581_v58 }
 0x21b   :  { %v590_v0 = vsel %vm587_vm9, %v589_v61, %v585_v63 }
 0x21c   :  { %v592_v4 = vmul.f32 %v590_v0, %v570_v57  ;;  %v595_v12 = vsub.f32 1.0, %v590_v0  ;;  %v601_v16 = vmul.f32 0.0, %v590_v0 }
 0x21e   :  { %v593_v5 = vadd.f32 %v592_v4, %v2372_v1 }
 0x220   :  { %1461 = vtanh.f32 %v593_v5 }
 0x221   :  { %1463 = vtanh.f32 %v669_v10 }
 0x226   :  { %v1462_v6 = vpop.eup %1461 }
 0x227   :  { %597 = vrot.lane.b32.xlu0 %v1462_v6, %s1865_s7  ;;  %v1464_v11 = vpop.eup %1463 }
 0x22f   :  { %673 = vrot.lane.b32.xlu0 %v1464_v11, %s1865_s7 }
 0x299   :  { %v598_v13 = vpop.permute.xlu0 %597 }
 0x29a   :  { %v600_v14 = vmul.f32 %v598_v13, %v595_v12 }
 0x29c   :  { %v2382_v18 = vadd.f32 %v601_v16, %v600_v14 }
 0x29e   :  { %680 = vrot.lane.b32.xlu1 %v2382_v18, %s1865_s7  ;;  %v766_v58 = vrot.slane %v2382_v18, 7 }
 0x2a1   :  { %v674_v22 = vpop.permute.xlu0 %673 }
 0x2a2   :  { %v676_v25 = vmul.f32 %v674_v22, %v671_v20 }
 0x2a4   :  { %v2386_v26 = vadd.f32 %v677_v23, %v676_v25 }
 0x2a6   :  { %770 = vrot.lane.b32.xlu1 %v2386_v26, %s1865_s7 }
 0x310   :  { %v2390_v27 = vpop.permute.xlu1 %680 }
 0x311   :  { %1397 = vmatmul.msk.f32.vlgmr.msra.gmra.mxu2 %vm528_vm10, %v2390_v27  ;;  %1398 = vmatmul.msk.f32.vlgmr.msra.gmra.mxu1 %vm528_vm10, %v2390_v27 }
 0x318   :  { %v771_v32 = vpop.permute.xlu1 %770 }
 0x319   :  { %1400 = vmatmul.msk.f32.vlgmr.msra.gmra.mxu3 %vm528_vm10, %v771_v32  ;;  %1401 = vmatmul.msk.f32.vlgmr.msra.gmra.mxu0 %vm528_vm10, %v771_v32 }
 0x31a   :  { %1410 = vmatpush.xpose.msk.msra.mxu3 %vm307_vm1, %v2397_v30  ;;  %1182 = vmatpush.msra.mxu0 %v2397_v30 }
 0x31c   :  { %1183 = vmatpush.msra.mxu0 %v2402_v33 }
 0x31e   :  { %1411 = vmatpush.xpose.msk.msra.mxu3 %vm307_vm1, %v2402_v33  ;;  %1184 = vmatpush.msra.mxu0 %v2408_v34 }
 0x322   :  { %1412 = vmatpush.xpose.msk.msra.mxu3 %vm307_vm1, %v2408_v34 }
 0x38e   :  { %v728_v49 = vpop.f32.mrf.mxu1 }
 0x38f   :  { %v729_v52 = vadd.f32 %v728_v49, %v2360_v45 }
 0x391   :  { %v755_v60 = vrot.slane %v729_v52, 7 }
 0x394   :  { %v708_v21 = vpop.f32.mrf.mxu2 }
 0x395   :  { %v709_v24 = vadd.f32 %v708_v21, %v2354_v28 }
 0x396   :  { %v811_v61 = vpop.f32.mrf.mxu0 }
 0x397   :  { %v732_v35 = vrot.slane %v709_v24, 7  ;;  %v812_v7 = vadd.f32 %v811_v61, %v2366_v56 }
 0x399   :  { %v734_v36 = vadd.f32 %v732_v35, %v2356_v31  ;;  %v838_v13 = vrot.slane %v812_v7, 6 }
 0x39b   :  { %v1399_v37 = vmul.f32 -1.442695, %v734_v36  ;;  %v849_v36 = vrot.slane %v2386_v26, 6 }
 0x39c   :  { %v791_v38 = vpop.f32.mrf.mxu3 }
 0x39d   :  { %1465 = vpow2.f32 %v1399_v37  ;;  %v792_v15 = vadd.f32 %v791_v38, %v2344_v17 }
 0x39f   :  { %v815_v39 = vrot.slane %v792_v15, 6 }
 0x3a1   :  { %v817_v40 = vadd.f32 %v815_v39, %v2346_v19 }
 0x3a3   :  { %v1466_v41 = vpop.eup %1465  ;;  %v1402_v42 = vmul.f32 -1.442695, %v817_v40 }
 0x3a4   :  { %v738_v43 = vadd.f32 1.0, %v1466_v41 }
 0x3a5   :  { %1467 = vpow2.f32 %v1402_v42 }
 0x3a6   :  { %1469 = vrcp.f32 %v738_v43  ;;  %v750_v51 = vand.u32 2147483648, %v738_v43  ;;  %v748_v54 = vand.u32 2147483647, %v738_v43  ;;  %vm744_vm12 = vweird.f32 %v738_v43 }
 0x3a8   :  { %v751_v59 = vor.u32 1.1754944e-38, %v750_v51  ;;  %vm749_vm14 = vcmp.eq.f32.partialorder %v748_v54, 8.507059e+37 }
 0x3ab   :  { %v1468_v44 = vpop.eup %1467 }
 0x3ac   :  { %v1470_v46 = vpop.eup %1469  ;;  %v821_v47 = vadd.f32 1.0, %v1468_v44 }
 0x3ad   :  { %v740_v48 = vmul.f32 %v1470_v46, %v738_v43  ;;  %vm745_vm11 = vweird.f32 %v1470_v46 }
 0x3ae   :  { %1471 = vrcp.f32 %v821_v47  ;;  %vm746_vm13 = vmor %vm744_vm12, %vm745_vm11  ;;  %v833_v5 = vand.u32 2147483648, %v821_v47  ;;  %v831_v10 = vand.u32 2147483647, %v821_v47  ;;  %vm827_vm2 = vweird.f32 %v821_v47 }
 0x3af   :  { %v741_v50 = vsub.f32 1.0, %v740_v48 }
 0x3b0   :  { %v834_v12 = vor.u32 1.1754944e-38, %v833_v5  ;;  %vm832_vm4 = vcmp.eq.f32.partialorder %v831_v10, 8.507059e+37 }
 0x3b1   :  { %v742_v53 = vmul.f32 %v1470_v46, %v741_v50 }
 0x3b3   :  { %v743_v55 = vadd.f32 %v1470_v46, %v742_v53 }
 0x3b4   :  { %v1472_v57 = vpop.eup %1471 }
 0x3b5   :  { %v823_v62 = vmul.f32 %v1472_v57, %v821_v47  ;;  %v747_v63 = vsel %vm746_vm13, %v1470_v46, %v743_v55  ;;  %vm828_vm15 = vweird.f32 %v1472_v57 }
 0x3b6   :  { %v752_v0 = vsel %vm749_vm14, %v751_v59, %v747_v63  ;;  %vm829_vm3 = vmor %vm827_vm2, %vm828_vm15  ;;  %vm1045_vm14 = vcmask 1041408   ;;  %vm1042_vm15 = vcmask 1040384   ;;  %vm1211_vm2 = vcmask 8192  }
 0x3b7   :  { %v824_v2 = vsub.f32 1.0, %v823_v62  ;;  %v757_v3 = vmul.f32 %v755_v60, %v752_v0  ;;  %v768_v4 = vmul.f32 %v766_v58, %v752_v0  ;;  %v760_v25 = vsub.f32 1.0, %v752_v0 }
 0x3b9   :  { %v825_v9 = vmul.f32 %v1472_v57, %v824_v2  ;;  %v758_v6 = vadd.f32 %v757_v3, %v2372_v1 }
 0x3bb   :  { %v826_v11 = vadd.f32 %v1472_v57, %v825_v9  ;;  %1473 = vtanh.f32 %v758_v6 }
 0x3bd   :  { %v830_v14 = vsel %vm829_vm3, %v1472_v57, %v826_v11  ;;  %vm1154_vm3 = vcmask 188416  }
 0x3be   :  { %v835_v16 = vsel %vm832_vm4, %v834_v12, %v830_v14  ;;  %vm1224_vm4 = vcmask 15360  }
 0x3bf   :  { %v840_v18 = vmul.f32 %v838_v13, %v835_v16  ;;  %v843_v35 = vsub.f32 1.0, %v835_v16  ;;  %v851_v15 = vmul.f32 %v849_v36, %v835_v16 }
 0x3c1   :  { %v1474_v20 = vpop.eup %1473  ;;  %v841_v22 = vadd.f32 %v840_v18, %v2377_v8 }
 0x3c2   :  { %762 = vrot.lane.b32.xlu2 %v1474_v20, %s1865_s7 }
 0x3c3   :  { %1475 = vtanh.f32 %v841_v22 }
 0x3c9   :  { %v1476_v23 = vpop.eup %1475 }
 0x3ca   :  { %845 = vrot.lane.b32.xlu2 %v1476_v23, %s1865_s7 }
 0x41c   :  { %v763_v29 = vpop.permute.xlu2 %762 }
 0x41d   :  { %v765_v32 = vmul.f32 %v763_v29, %v760_v25 }
 0x41f   :  { %v2427_v21 = vadd.f32 %v768_v4, %v765_v32 }
 0x421   :  { %v865_v24 = vrot.slane %v2427_v21, 1 }
 0x423   :  { %866 = vrot.lane.b32.xlu0 %v865_v24, %s1865_s7  ;;  %v945_v24 = vrot.slane %v2427_v21, 7 }
 0x424   :  { %v846_v37 = vpop.permute.xlu2 %845 }
 0x425   :  { %v848_v38 = vmul.f32 %v846_v37, %v843_v35 }
 0x427   :  { %v2432_v39 = vadd.f32 %v851_v15, %v848_v38 }
 0x429   :  { %v860_v40 = vrot.slane %v2432_v39, 2  ;;  %v1026_v18 = vrot.slane %v2432_v39, 6 }
 0x42b   :  { %861 = vrot.lane.b32.xlu1 %v860_v40, %s1865_s7  ;;  %v1064_v40 = vld [vmem:[%s2642_s10 + $0x70] sm:$0xff] }
 0x495   :  { %v867_v41 = vpop.permute.xlu0 %866 }
 0x496   :  { %1403 = vmatmul.msk.f32.vlgmr.msrb.gmra.mxu2 %vm528_vm10, %v867_v41  ;;  %1404 = vmatmul.msk.f32.vlgmr.msrb.gmra.mxu1 %vm528_vm10, %v867_v41  ;;  %v1063_v41 = vld [vmem:[%s2642_s10 + $0x68] sm:$0xff] }
 0x49d   :  { %v2438_v42 = vpop.permute.xlu1 %861 }
 0x49e   :  { %1406 = vmatmul.msk.f32.vlgmr.msrb.gmra.mxu3 %vm528_vm10, %v2438_v42  ;;  %1407 = vmatmul.msk.f32.vlgmr.msrb.gmra.mxu0 %vm528_vm10, %v2438_v42 }
 0x49f   :  { %1267 = vmatpush.msrb.mxu0 %v2397_v30 }
 0x4a1   :  { %1268 = vmatpush.msrb.mxu0 %v2402_v33 }
 0x4a3   :  { %1269 = vmatpush.msrb.mxu0 %v2408_v34 }
 0x513   :  { %v907_v57 = vpop.f32.mrf.mxu1 }
 0x514   :  { %v908_v59 = vadd.f32 %v907_v57, %v2360_v45  ;;  %v1050_v57 = vld [vmem:[%s2642_s10] sm:$0xff] }
 0x516   :  { %v934_v63 = vrot.slane %v908_v59, 6  ;;  %v1071_v59 = vld [vmem:[%s2642_s10 + $0xa8] sm:$0xff] }
 0x519   :  { %v887_v43 = vpop.f32.mrf.mxu2 }
 0x51a   :  { %v888_v44 = vadd.f32 %v887_v43, %v2354_v28  ;;  %v1061_v43 = vld [vmem:[%s2642_s10 + $0x58] sm:$0xff] }
 0x51b   :  { %v988_v2 = vpop.f32.mrf.mxu0 }
 0x51c   :  { %v911_v46 = vrot.slane %v888_v44, 6  ;;  %v989_v9 = vadd.f32 %v988_v2, %v2366_v56  ;;  %v1060_v44 = vld [vmem:[%s2642_s10 + $0x50] sm:$0xff] }
 0x51e   :  { %v913_v47 = vadd.f32 %v911_v46, %v2356_v31  ;;  %v1015_v14 = vrot.slane %v989_v9, 4  ;;  %v1059_v46 = vld [vmem:[%s2642_s10 + $0x48] sm:$0xff] }
 0x520   :  { %v1405_v48 = vmul.f32 -1.442695, %v913_v47  ;;  %v1058_v47 = vld [vmem:[%s2642_s10 + $0x40] sm:$0xff] }
 0x521   :  { %v968_v49 = vpop.f32.mrf.mxu3 }
 0x522   :  { %1477 = vpow2.f32 %v1405_v48  ;;  %v969_v50 = vadd.f32 %v968_v49, %v2344_v17  ;;  %v1057_v48 = vld [vmem:[%s2642_s10 + $0x38] sm:$0xff]  ;;  %v1056_v49 = vld [vmem:[%s2642_s10 + $0x30] sm:$0xff] }
 0x524   :  { %v992_v51 = vrot.slane %v969_v50, 4  ;;  %v1055_v50 = vld [vmem:[%s2642_s10 + $0x28] sm:$0xff] }
 0x526   :  { %v994_v52 = vadd.f32 %v992_v51, %v2346_v19  ;;  %v1054_v51 = vld [vmem:[%s2642_s10 + $0x20] sm:$0xff] }
 0x528   :  { %v1478_v53 = vpop.eup %1477  ;;  %v1408_v30 = vmul.f32 -1.442695, %v994_v52 }
 0x529   :  { %v917_v54 = vadd.f32 1.0, %v1478_v53 }
 0x52a   :  { %1479 = vpow2.f32 %v1408_v30 }
 0x52b   :  { %1481 = vrcp.f32 %v917_v54  ;;  %v929_v58 = vand.u32 2147483648, %v917_v54  ;;  %v927_v17 = vand.u32 2147483647, %v917_v54  ;;  %vm923_vm6 = vweird.f32 %v917_v54 }
 0x52d   :  { %v930_v62 = vor.u32 1.1754944e-38, %v929_v58  ;;  %vm928_vm8 = vcmp.eq.f32.partialorder %v927_v17, 8.507059e+37  ;;  %v1072_v58 = vld [vmem:[%s2642_s10 + $0xb0] sm:$0xff]  ;;  %v1069_v17 = vld [vmem:[%s2642_s10 + $0x98] sm:$0xff] }
 0x530   :  { %v1480_v33 = vpop.eup %1479 }
 0x531   :  { %v1482_v34 = vpop.eup %1481  ;;  %v998_v55 = vadd.f32 1.0, %v1480_v33 }
 0x532   :  { %v919_v28 = vmul.f32 %v1482_v34, %v917_v54  ;;  %vm924_vm5 = vweird.f32 %v1482_v34 }
 0x533   :  { %1483 = vrcp.f32 %v998_v55  ;;  %vm925_vm7 = vmor %vm923_vm6, %vm924_vm5  ;;  %v1010_v10 = vand.u32 2147483648, %v998_v55  ;;  %v1008_v6 = vand.u32 2147483647, %v998_v55  ;;  %vm1004_vm11 = vweird.f32 %v998_v55 }
 0x534   :  { %v920_v31 = vsub.f32 1.0, %v919_v28  ;;  %v1051_v28 = vld [vmem:[%s2642_s10 + $0x8] sm:$0xff] }
 0x535   :  { %v1011_v13 = vor.u32 1.1754944e-38, %v1010_v10  ;;  %vm1009_vm13 = vcmp.eq.f32.partialorder %v1008_v6, 8.507059e+37 }
 0x536   :  { %v921_v60 = vmul.f32 %v1482_v34, %v920_v31  ;;  %v1073_v31 = vld [vmem:[%s2642_s10 + $0xb8] sm:$0xff] }
 0x537   :  { %1109 = vmatpush.msra.mxu1 %v1073_v31 }
 0x538   :  { %v922_v61 = vadd.f32 %v1482_v34, %v921_v60  ;;  %v1070_v60 = vld [vmem:[%s2642_s10 + $0xa0] sm:$0xff] }
 0x539   :  { %v1484_v19 = vpop.eup %1483  ;;  %1110 = vmatpush.msra.mxu1 %v1072_v58  ;;  %v1289_v58 = vld [vmem:[%s2649_s17 + $0x10] sm:$0xff] }
 0x53a   :  { %v926_v0 = vsel %vm925_vm7, %v1482_v34, %v922_v61  ;;  %v1000_v3 = vmul.f32 %v1484_v19, %v998_v55  ;;  %vm1005_vm9 = vweird.f32 %v1484_v19  ;;  %v1053_v34 = vld [vmem:[%s2642_s10 + $0x18] sm:$0xff]  ;;  %v1052_v55 = vld [vmem:[%s2642_s10 + $0x10] sm:$0xff] }
 0x53b   :  { %v931_v4 = vsel %vm928_vm8, %v930_v62, %v926_v0  ;;  %vm1006_vm12 = vmor %vm1004_vm11, %vm1005_vm9  ;;  %1111 = vmatpush.msra.mxu1 %v1071_v59  ;;  %v1068_v61 = vld [vmem:[%s2642_s10 + $0x90] sm:$0xff]  ;;  %v858_v62 = vrot.slane %v2432_v39, 1  ;;  %v1288_v59 = vld [vmem:[%s2649_s17 + $0x8] sm:$0xff] }
 0x53c   :  { %v1001_v7 = vsub.f32 1.0, %v1000_v3  ;;  %v936_v5 = vmul.f32 %v934_v63, %v931_v4  ;;  %v939_v32 = vsub.f32 1.0, %v931_v4  ;;  %v947_v36 = vmul.f32 %v945_v24, %v931_v4  ;;  %v1067_v3 = vld [vmem:[%s2642_s10 + $0x88] sm:$0xff]  ;;  %v1066_v4 = vld [vmem:[%s2642_s10 + $0x80] sm:$0xff] }
 0x53d   :  { %1112 = vmatpush.msra.mxu1 %v1070_v60  ;;  %v1287_v60 = vld [vmem:[%s2649_s17] sm:$0xff] }
 0x53e   :  { %v1002_v45 = vmul.f32 %v1484_v19, %v1001_v7  ;;  %v937_v11 = vadd.f32 %v936_v5, %v2372_v1  ;;  %v684_v1 = vrot.slane %v2386_v26, 1  ;;  %v688_v7 = vsel %vm528_vm10, %v2390_v27, %v2386_v26  ;;  %v1452_v26 = vld [vmem:[#allocation11] ss:$0 sm:$0xff] }
 0x53f   :  { %1113 = vmatpush.msra.mxu1 %v1069_v17  ;;  %v1333_v17 = vld [vmem:[%s2651_s19 + $0x38] sm:$0xff] }
 0x540   :  { %v1003_v12 = vadd.f32 %v1484_v19, %v1002_v45  ;;  %1485 = vtanh.f32 %v937_v11  ;;  %1346 = vmatpush.msrb.mxu3 %v1333_v17 }
 0x541   :  { %1114 = vmatpush.msra.mxu1 %v1068_v61  ;;  %v1332_v61 = vld [vmem:[%s2651_s19 + $0x30] sm:$0xff] }
 0x542   :  { %v1007_v16 = vsel %vm1006_vm12, %v1484_v19, %v1003_v12  ;;  %1347 = vmatpush.msrb.mxu3 %v1332_v61 }
 0x543   :  { %v1012_v20 = vsel %vm1009_vm13, %v1011_v13, %v1007_v16  ;;  %1115 = vmatpush.msra.mxu1 %v1067_v3 }
 0x544   :  { %v1017_v22 = vmul.f32 %v1015_v14, %v1012_v20  ;;  %v1028_v23 = vmul.f32 %v1026_v18, %v1012_v20  ;;  %v1020_v52 = vsub.f32 1.0, %v1012_v20 }
 0x545   :  { %1116 = vmatpush.msra.mxu1 %v1066_v4 }
 0x546   :  { %v1486_v56 = vpop.eup %1485  ;;  %v1018_v25 = vadd.f32 %v1017_v22, %v2377_v8  ;;  %v1065_v8 = vld [vmem:[%s2642_s10 + $0x78] sm:$0xff] }
 0x547   :  { %941 = vrot.lane.b32.xlu2 %v1486_v56, %s1865_s7  ;;  %1081 = vmatpush.msra.mxu2 %v1065_v8 }
 0x548   :  { %1487 = vtanh.f32 %v1018_v25 }
 0x549   :  { %1082 = vmatpush.msra.mxu2 %v1064_v40  ;;  %v1223_v40 = vld [vmem:[#allocation22] sm:$0x3] }
 0x54b   :  { %1083 = vmatpush.msra.mxu2 %v1063_v41 }
 0x54e   :  { %v1488_v29 = vpop.eup %1487 }
 0x54f   :  { %1022 = vrot.lane.b32.xlu0 %v1488_v29, %s1865_s7  ;;  %685 = vrot.lane.b32.xlu2 %v684_v1, %s1865_s7 }
 0x5a1   :  { %v942_v35 = vpop.permute.xlu2 %941 }
 0x5a2   :  { %v944_v37 = vmul.f32 %v942_v35, %v939_v32 }
 0x5a4   :  { %v948_v38 = vadd.f32 %v947_v36, %v944_v37 }
 0x5a6   :  { %v1445_v15 = vpack.i.bf16 %v948_v38, %v2427_v21  ;;  %v1062_v21 = vld [vmem:[%s2642_s10 + $0x60] sm:$0xff]  ;;  %s1866_s10 = smov 32  }
 0x5a7   :  { %1084 = vmatpush.msra.mxu2 %v1062_v21 }
 0x5a8   :  { %1446 = vrot.lane.b32.xlu1 %v1445_v15, %s1865_s7 }
 0x5a9   :  { %1085 = vmatpush.msra.mxu2 %v1061_v43  ;;  %v686_v6 = vpop.permute.xlu2 %685 }
 0x5aa   :  { %v1044_v11 = vsel %vm1042_vm15, %v686_v6, %v2438_v42 }
 0x5ab   :  { %1086 = vmatpush.msra.mxu2 %v1060_v44 }
 0x5ad   :  { %1087 = vmatpush.msra.mxu2 %v1059_v46 }
 0x5af   :  { %1088 = vmatpush.msra.mxu2 %v1058_v47 }
 0x5b1   :  { %1089 = vmatpush.msra.mxu2 %v1057_v48 }
 0x5b3   :  { %1090 = vmatpush.msra.mxu2 %v1056_v49 }
 0x5b5   :  { %1091 = vmatpush.msra.mxu2 %v1055_v50 }
 0x5b7   :  { %1092 = vmatpush.msra.mxu2 %v1054_v51  ;;  %v1298_v51 = vld [vmem:[%s2649_s17 + $0x58] sm:$0xff] }
 0x5b9   :  { %1093 = vmatpush.msra.mxu2 %v1053_v34  ;;  %v1292_v34 = vld [vmem:[%s2649_s17 + $0x28] sm:$0xff] }
 0x5bb   :  { %1094 = vmatpush.msra.mxu2 %v1052_v55  ;;  %v1291_v55 = vld [vmem:[%s2649_s17 + $0x20] sm:$0xff] }
 0x5bd   :  { %1095 = vmatpush.msra.mxu2 %v1051_v28  ;;  %v1290_v28 = vld [vmem:[%s2649_s17 + $0x18] sm:$0xff] }
 0x5bf   :  { %1096 = vmatpush.msra.mxu2 %v1050_v57 }
 0x5c1   :  { %v1023_v53 = vpop.permute.xlu0 %1022  ;;  %1417 = vmatpush.msk.msrb.mxu2 %vm1045_vm14, %v1223_v40 }
 0x5c2   :  { %v1025_v30 = vmul.f32 %v1023_v53, %v1020_v52  ;;  %v1297_v52 = vld [vmem:[%s2649_s17 + $0x50] sm:$0xff]  ;;  %v1296_v53 = vld [vmem:[%s2649_s17 + $0x48] sm:$0xff] }
 0x5c4   :  { %v1029_v54 = vadd.f32 %v1028_v23, %v1025_v30  ;;  %v1295_v30 = vld [vmem:[%s2649_s17 + $0x40] sm:$0xff] }
 0x5c6   :  { %v1037_v33 = vrot.slane %v1029_v54, 3  ;;  %v1035_v63 = vrot.slane %v1029_v54, 2  ;;  %v1294_v54 = vld [vmem:[%s2649_s17 + $0x38] sm:$0xff] }
 0x5c8   :  { %1038 = vrot.lane.b32.xlu0 %v1037_v33, %s1865_s7  ;;  %v1293_v33 = vld [vmem:[%s2649_s17 + $0x30] sm:$0xff] }
 0x61a   :  { %v1447_v19 = vpop.permute.xlu1 %1446 }
 0x61b   :  { %v1449_v0 = vunpack.i.h.bf16 %v1447_v19  ;;  %v1448_v2 = vunpack.i.l.bf16 %v1447_v19  ;;  %v1331_v19 = vld [vmem:[%s2651_s19 + $0x28] sm:$0xff] }
 0x61c   :  { %1348 = vmatpush.msrb.mxu3 %v1331_v19 }
 0x61d   :  { %v864_v39 = vsel %vm528_vm10, %v1448_v2, %v858_v62  ;;  %v1041_v5 = vsel %vm528_vm10, %v1449_v0, %v1035_v63  ;;  %v1330_v62 = vld [vmem:[%s2651_s19 + $0x20] sm:$0xff]  ;;  %v1329_v63 = vld [vmem:[%s2651_s19 + $0x18] sm:$0xff] }
 0x61e   :  { %v1043_v9 = vsel %vm1042_vm15, %v688_v7, %v864_v39  ;;  %1349 = vmatpush.msrb.mxu3 %v1330_v62 }
 0x61f   :  { %v1046_v10 = vsel %vm1045_vm14, %v1043_v9, %v1041_v5  ;;  %v1328_v5 = vld [vmem:[%s2651_s19 + $0x10] sm:$0xff]  ;;  %v1327_v9 = vld [vmem:[%s2651_s19 + $0x8] sm:$0xff] }
 0x620   :  { %v1048_v45 = vmax.f32 %v1046_v10, 0.0  ;;  %1350 = vmatpush.msrb.mxu3 %v1329_v63  ;;  %v1326_v10 = vld [vmem:[%s2651_s19] sm:$0xff] }
 0x622   :  { %1097 = vmatmul.f32.vlgmr.msra.gmra.mxu2 %v1048_v45  ;;  %1351 = vmatpush.msrb.mxu3 %v1328_v5  ;;  %v1299_v45 = vld [vmem:[%s2650_s18] sm:$0x1] }
 0x624   :  { %1352 = vmatpush.msrb.mxu3 %v1327_v9 }
 0x626   :  { %1353 = vmatpush.msrb.mxu3 %v1326_v10 }
 0x63a   :  { %v1039_v12 = vpop.permute.xlu0 %1038 }
 0x63b   :  { %v1047_v13 = vsel %vm1045_vm14, %v1044_v11, %v1039_v12 }
 0x63c   :  { %v1049_v14 = vmax.f32 %v1047_v13, 0.0  ;;  %v1334_v13 = vld [vmem:[#allocation20] sm:$0x1] }
 0x63e   :  { %1409 = vmatmul.msk.f32.vlgmr.msra.gmra.mxu1 %vm528_vm10, %v1049_v14 }
 0x6a5   :  { %v1098_v27 = vpop.f32.mrf.mxu2 }
 0x6a6   :  { %v1099_v16 = vadd.f32 %v1452_v26, %v1098_v27 }
 0x6bb   :  { %v1118_v18 = vpop.f32.mrf.mxu1 }
 0x6bc   :  { %v2546_v20 = vadd.f32 %v1118_v18, %v1099_v16 }
 0x6be   :  { %v1122_v22 = vrot.slane %v2546_v20, 2  ;;  %1415 = vmatpush.xpose.msk.msrb.mxu1 %vm307_vm1, %v2546_v20 }
 0x6c0   :  { %1413 = vmatmul.msk.f32.vlgmr.msra.gmra.mxu3 %vm307_vm1, %v1122_v22 }
 0x6c1   :  { %1416 = vmatmul.msk.f32.vlgmr.msrb.gmra.mxu1 %vm307_vm1, %v1122_v22 }
 0x6c2   :  { %1309 = vmatpush.msra.mxu1 %v1298_v51 }
 0x6c4   :  { %1310 = vmatpush.msra.mxu1 %v1297_v52 }
 0x6c6   :  { %1311 = vmatpush.msra.mxu1 %v1296_v53 }
 0x6c8   :  { %1312 = vmatpush.msra.mxu1 %v1295_v30 }
 0x6ca   :  { %1313 = vmatpush.msra.mxu1 %v1294_v54 }
 0x6cc   :  { %1314 = vmatpush.msra.mxu1 %v1293_v33 }
 0x6ce   :  { %1315 = vmatpush.msra.mxu1 %v1292_v34 }
 0x6d0   :  { %1316 = vmatpush.msra.mxu1 %v1291_v55 }
 0x6d2   :  { %1317 = vmatpush.msra.mxu1 %v1290_v28 }
 0x6d4   :  { %1318 = vmatpush.msra.mxu1 %v1289_v58 }
 0x6d6   :  { %1319 = vmatpush.msra.mxu1 %v1288_v59 }
 0x6d8   :  { %1320 = vmatpush.msra.mxu1 %v1287_v60 }
 0x73e   :  { %v1208_v42 = vpop.f32.mrf.mxu1 }
 0x73f   :  { %v1212_v23 = vsel %vm1211_vm2, %v1208_v42, -inf }
 0x740   :  { %1213 = vmax.xlane.f32.xlu1 %v1212_v23 }
 0x743   :  { %v1151_v56 = vpop.f32.mrf.mxu3 }
 0x744   :  { %v1155_v25 = vsel %vm1154_vm3, %v1151_v56, -inf }
 0x745   :  { %1156 = vmax.xlane.f32.xlu0 %v1155_v25 }
 0x7b3   :  { %v1214_v1 = vpop.xlane.xlu1 %1213 }
 0x7b4   :  { %v1215_v29 = vsub.f32 %v1208_v42, %v1214_v1 }
 0x7b6   :  { %v1216_v32 = vmul.f32 1.442695, %v1215_v29 }
 0x7b8   :  { %1489 = vpow2.f32 %v1216_v32  ;;  %v1157_v24 = vpop.xlane.xlu0 %1156 }
 0x7b9   :  { %v1158_v35 = vsub.f32 %v1151_v56, %v1157_v24 }
 0x7bb   :  { %v1159_v36 = vmul.f32 1.442695, %v1158_v35 }
 0x7bd   :  { %1491 = vpow2.f32 %v1159_v36 }
 0x7be   :  { %v1490_v37 = vpop.eup %1489 }
 0x7bf   :  { %v1218_v38 = vsel %vm1211_vm2, %v1490_v37, 0.0 }
 0x7c0   :  { %1219 = vadd.xlane.f32.xlu2 %v1218_v38 }
 0x7c3   :  { %v1492_v15 = vpop.eup %1491 }
 0x7c4   :  { %v1161_v8 = vsel %vm1154_vm3, %v1492_v15, 0.0 }
 0x7c8   :  { %1162 = vadd.xlane.f32.xlu2 %v1161_v8 }
 0x833   :  { %v1220_v41 = vpop.xlane.xlu2 %1219 }
 0x834   :  { %1493 = vrcp.f32 %v1220_v41 }
 0x83a   :  { %v1494_v21 = vpop.eup %1493 }
 0x83b   :  { %v1222_v43 = vmul.f32 %v1494_v21, %v1490_v37  ;;  %v1163_v44 = vpop.xlane.xlu2 %1162 }
 0x83c   :  { %1495 = vrcp.f32 %v1163_v44 }
 0x83d   :  { %1418 = vmatmul.msk.f32.vlgmr.msrb.gmra.mxu2 %vm1224_vm4, %v1222_v43 }
 0x842   :  { %v1496_v46 = vpop.eup %1495 }
 0x843   :  { %v1165_v47 = vmul.f32 %v1496_v46, %v1492_v15 }
 0x845   :  { %1414 = vmatmul.msk.f32.vlgmr.msra.gmra.mxu0 %vm264_vm0, %v1165_v47 }
 0x8c0   :  { %v1248_v48 = vpop.f32.mrf.mxu2 }
 0x8c1   :  { %1419 = vmatmul.msk.f32.vlgmr.msrb.gmra.mxu0 %vm264_vm0, %v1248_v48  ;;  %vm1302_vm0 = vcmask 785408  }
 0x8c2   :  { %v1186_v49 = vpop.f32.mrf.mxu0 }
 0x8c3   :  { %v1275_v50 = vrot.slane %v1186_v49, 6 }
 0x8c5   :  { %1276 = vrot.lane.b32.xlu1 %v1275_v50, %s1866_s10 }
 0x937   :  { %v1277_v0 = vpop.permute.xlu1 %1276 }
 0x938   :  { %v1284_v2 = vsel %vm307_vm1, %v2546_v20, %v1277_v0 }
 0x93e   :  { %v1271_v57 = vpop.f32.mrf.mxu0 }
 0x93f   :  { %v1280_v31 = vrot.slane %v1271_v57, 6 }
 0x941   :  { %1281 = vrot.lane.b32.xlu2 %v1280_v31, %s1865_s7 }
 0x99b   :  { %v1282_v3 = vpop.permute.xlu2 %1281 }
 0x99c   :  { %v1285_v4 = vsel %vm528_vm10, %v1284_v2, %v1282_v3 }
 0x99d   :  { %v1286_v7 = vmax.f32 %v1285_v4, 0.0 }
 0x99f   :  { %v1301_v39 = vrot.slane %v1286_v7, 2 }
 0x9a1   :  { %1420 = vmatmul.msk.f32.vlgmr.msra.gmra.mxu1 %vm1302_vm0, %v1301_v39 }
 0xa1e   :  { %v1322_v6 = vpop.f32.mrf.mxu1 }
 0xa1f   :  { %v1323_v11 = vadd.f32 %v1322_v6, %v1299_v45 }
 0xa21   :  { %v1325_v12 = vmax.f32 %v1323_v11, 0.0 }
 0xa23   :  { %1421 = vmatmul.msk.f32.vlgmr.msrb.gmra.mxu3 %vm528_vm10, %v1325_v12 }
 0xaa6   :  { %v1355_v14 = vpop.f32.mrf.mxu3 }
 0xaa7   :  { %v1356_v26 = vadd.f32 %v1355_v14, %v1334_v13 }
 0xaa9   :  { %1358 = vst.msk [vmem:[#allocation23] sm:$0x1] %vm1154_vm3, %v1356_v26 }
 0xaaa   :  { %1369 = dma.vmem_to_hbm [thread:$0]  %s1365_s0, 16, %s1367_s6, [#allocation4]  }
 0xaab   :  { %1847 = dma.done.wait [#allocation4], 16  }
 0xaac   :  { %1848 = vsyncadd [#allocation4], 4294967280 }
 0xaad   :  { %1374 = vsyncpa [#allocation3], 1 }
 0xaae   :  { %1375 = vsyncpa [#allocation6], 1 }
 0xaaf   :  { %1376 = vsyncpa [#allocation9], 1 }
 0xab0   :  { %1377 = vsyncpa [#allocation12], 1 }
 0xab1   :  { %1378 = vsyncpa [#allocation15], 1 }
 0xab2   :  { %1379 = vsyncpa [#allocation18], 1 }
 0xab3   :  { %1380 = vsyncpa [#allocation21], 1 }
 0xab4   :  { %1381 = vsyncpa [#allocation4], 1 }

</bundles_post_ra>
